<compile_context>
chip_gen: v6e
topology: v6e:2x2x1
jax: 0.10.0
libtpu: 0.0.40
codegen_flags: <defaults>
</compile_context>

<pallas_src>
import math

import numpy as np

import jax
import jax.numpy as jnp
from jax import lax
from jax.experimental import pallas as pl
from jax.experimental.pallas import tpu as pltpu

# ----------------------------- config ---------------------------------------
VOCAB = 128
TYPE_VOCAB = 2
HIDDEN = 64
NUM_HEADS = 4
HEAD_DIM = HIDDEN // NUM_HEADS
INTERMEDIATE = 128
NUM_LAYERS = 3
SEQ = 8
MAX_REL = SEQ            # DeBERTa "att_span" (position_buckets=0, no log-bucketing)
LN_EPS = 1e-7            # DeBERTa layer_norm_eps

# hidden_states = [emb, layer_0, ..., layer_{L-1}]; [-3] is layer_{L-3}'s output,
# so only layers 0 .. L-3 influence the module's return value.
N_COMPUTE_LAYERS = NUM_LAYERS - 2
assert N_COMPUTE_LAYERS >= 1


# --------------------------- in-kernel helpers --------------------------------

def _layer_norm(x, g, b):
    x = x.astype(jnp.float32)
    mu = jnp.mean(x, axis=-1, keepdims=True)
    var = jnp.mean((x - mu) ** 2, axis=-1, keepdims=True)
    return (x - mu) * jax.lax.rsqrt(var + LN_EPS) * g + b


def _erf(x):
    # Abramowitz & Stegun 7.1.26 rational approximation (|err| < 1.5e-7), i.e.
    # f32-exact erf GELU, built only from abs/where/mul/add/exp which lower
    # cleanly in Mosaic (HF DeBERTa uses the exact erf GELU, not tanh).
    a1, a2, a3, a4, a5 = 0.254829592, -0.284496736, 1.421413741, -1.453152027, 1.061405429
    p = 0.3275911
    z = jnp.abs(x)
    t = 1.0 / (1.0 + p * z)
    poly = ((((a5 * t + a4) * t + a3) * t + a2) * t + a1) * t
    y = 1.0 - poly * jnp.exp(-z * z)
    return jnp.where(x < 0, -y, y)


def _gelu_exact(x):
    return 0.5 * x * (1.0 + _erf(x * (1.0 / math.sqrt(2.0))))


# ------------------------------ fused kernel ----------------------------------

def _deberta_kernel(ids_ref, tt_ref, amcol_ref, amrow_ref, gat_ref,
                    wemb_ref, temb_ref, embg_ref, embb_ref,
                    relemb_ref, relg_ref, relb_ref,
                    qkvw_ref, qkvb_ref, ow_ref, ob_ref,
                    ln1g_ref, ln1b_ref, iw_ref, ib_ref, fw_ref, fb_ref,
                    ln2g_ref, ln2b_ref, out_ref):
    f32 = jnp.float32

    # ---- embeddings, fully in-kernel ----------------------------------------
    # Word embedding: iota one-hot compare (one VPU op on an (8,128) vreg) then
    # a single lane-dense (S, V) @ (V, H) MXU matmul.
    vocab_iota = lax.broadcasted_iota(jnp.int32, (SEQ, VOCAB), 1)
    onehot_tok = (ids_ref[...] == vocab_iota).astype(f32)                      # (S, V)
    x = jnp.dot(onehot_tok, wemb_ref[...], preferred_element_type=f32)         # (S, H)
    # Token-type embedding: TYPE_VOCAB is tiny, so a static VPU select-sum
    # avoids a degenerate K=2 matmul.
    tt = tt_ref[...]                                                           # (S, 1)
    for t in range(TYPE_VOCAB):
        x = x + (tt == t).astype(f32) * temb_ref[t:t + 1, :]

    # ---- attention mask (HF: mask[:,None] * mask[None,:]) --------------------
    amcol = amcol_ref[...]                                                     # (S, 1)
    amask = amcol * amrow_ref[...]                                             # (S, S) in {0,1}
    neg_bias = (amask - 1.0) * f32(1e30)                                       # 0 / -1e30 additive

    # Embedding LayerNorm then attention-mask zeroing (DebertaV2Embeddings).
    x = _layer_norm(x, embg_ref[...], embb_ref[...]) * amcol                   # (S, H)
    # Relative-position embeddings, LayerNormed (DebertaV2Encoder.get_rel_embedding).
    rel = _layer_norm(relemb_ref[...], relg_ref[...], relb_ref[...])           # (2K, H)

    gat = gat_ref[...]                                                         # (S*S, 2K) one-hot
    scale = f32(1.0 / math.sqrt(HEAD_DIM * 3))                                 # scale_factor = 3

    for l in range(N_COMPUTE_LAYERS):       # static unroll; all operands VMEM-resident
        # ---- merged Q/K/V (+ shared-key relative projections): one MXU matmul ----
        xr = jnp.concatenate([x, rel], axis=0)                                     # (S+2K, H)
        qkv = jnp.dot(xr, qkvw_ref[l], preferred_element_type=f32) + qkvb_ref[l]   # (S+2K, 3H)
        q = qkv[:SEQ, 0:HIDDEN]
        k = qkv[:SEQ, HIDDEN:2 * HIDDEN]
        v = qkv[:SEQ, 2 * HIDDEN:3 * HIDDEN]

        # ---- disentangled-bias gathers as ONE lane-dense one-hot matmul ----------
        # g[i*S+j, 0:H]   = pos_q[clip(i-j+K), :]   (p2c term)
        # g[i*S+j, H:2H]  = pos_k[clip(i-j+K), :]   (c2p term)
        g = jnp.dot(gat, qkv[SEQ:, 0:2 * HIDDEN], preferred_element_type=f32)      # (S*S, 2H)
        g = g.reshape(SEQ, SEQ, 2 * HIDDEN)

        # ---- attention: all heads in one kernel, static head loop, lane slices ----
        ctx_cols = []
        for h in range(NUM_HEADS):
            sl = slice(h * HEAD_DIM, (h + 1) * HEAD_DIM)
            qh, kh, vh = q[:, sl], k[:, sl], v[:, sl]                              # (S, d)
            s_c = jnp.dot(qh, kh.T, preferred_element_type=f32)                    # content->content
            gk = g[:, :, HIDDEN + h * HEAD_DIM:HIDDEN + (h + 1) * HEAD_DIM]
            gq = g[:, :, h * HEAD_DIM:(h + 1) * HEAD_DIM]
            c2p = jnp.sum(qh[:, None, :] * gk, axis=-1)                            # content->position
            p2c = jnp.sum(kh[None, :, :] * gq, axis=-1)                            # position->content
            # XSoftmax with arithmetic masking: additive -1e30 bias, softmax,
            # multiplicative re-zero; guarded denominator so a fully-masked row
            # yields zeros (HF behaviour), never NaN.
            s = (s_c + c2p + p2c) * scale + neg_bias
            s = s - jnp.max(s, axis=-1, keepdims=True)
            p = jnp.exp(s) * amask
            p = p / jnp.maximum(jnp.sum(p, axis=-1, keepdims=True), f32(1e-30))
            ctx_cols.append(jnp.dot(p, vh, preferred_element_type=f32))
        ctx = jnp.concatenate(ctx_cols, axis=1)                                    # (S, H) lane-dense

        # ---- attention output projection + residual + LayerNorm (fused) ----
        attn = jnp.dot(ctx, ow_ref[l], preferred_element_type=f32) + ob_ref[l]
        x = _layer_norm(attn + x, ln1g_ref[l], ln1b_ref[l])

        # ---- FFN with exact erf-GELU + residual + LayerNorm (fused) ----
        inter = _gelu_exact(jnp.dot(x, iw_ref[l], preferred_element_type=f32) + ib_ref[l])
        ffn = jnp.dot(inter, fw_ref[l], preferred_element_type=f32) + fb_ref[l]
        x = _layer_norm(ffn + x, ln2g_ref[l], ln2b_ref[l])

    # x is now the output of encoder layer L-3 == hidden_states[-3][0].
    out_ref[...] = x.astype(out_ref.dtype)


# ------------------------------ model glue -----------------------------------

def _build_gather_matrix():
    """Static one-hot (S*S, 2K) matrix G with G[i*S+j, clip(i-j+K)] = 1."""
    pos = np.arange(SEQ)
    rel_pos = pos[:, None] - pos[None, :]                       # i - j
    idx = np.clip(rel_pos + MAX_REL, 0, 2 * MAX_REL - 1)        # (S, S)
    gat = np.zeros((SEQ * SEQ, 2 * MAX_REL), np.float32)
    gat[np.arange(SEQ * SEQ), idx.reshape(-1)] = 1.0
    return jnp.asarray(gat)


@jax.jit
def ort_deberta_forward(input_ids, token_type_ids, attention_mask, params):
    """Equivalent of ORTDeberta.forward: returns hidden_states[-3][0] -> (S, H)."""
    ids = input_ids[0].astype(jnp.int32)[:, None]                # (S, 1)
    tts = token_type_ids[0].astype(jnp.int32)[:, None]           # (S, 1)
    am = attention_mask[0].astype(jnp.float32)
    am_col, am_row = am[:, None], am[None, :]                    # (S,1), (1,S)
    gat = _build_gather_matrix()                                 # compile-time constant
    nl = N_COMPUTE_LAYERS                                        # drop dead layers' weights

    return pl.pallas_call(
        _deberta_kernel,
        out_shape=jax.ShapeDtypeStruct((SEQ, HIDDEN), jnp.float32),
        # No grid: whole problem is one VMEM-resident block (< 1 MiB total),
        # well inside every generation's budget incl. v7x's 64 MiB VMEM.
        compiler_params=pltpu.CompilerParams(vmem_limit_bytes=32 * 1024 * 1024),
    )(ids, tts, am_col, am_row, gat,
      params["word_emb"], params["type_emb"],
      params["emb_ln_g"], params["emb_ln_b"],
      params["rel_emb"], params["rel_ln_g"], params["rel_ln_b"],
      params["qkv_w"][:nl], params["qkv_b"][:nl],
      params["o_w"][:nl], params["o_b"][:nl],
      params["ln1_g"][:nl], params["ln1_b"][:nl],
      params["i_w"][:nl], params["i_b"][:nl],
      params["f_w"][:nl], params["f_b"][:nl],
      params["ln2_g"][:nl], params["ln2_b"][:nl])


# --------------------------- deterministic init -------------------------------

def init_params(key):
    def dense(k, din, dout):
        return 0.02 * jax.random.normal(k, (din, dout), jnp.float32)

    keys = jax.random.split(key, 3 + NUM_LAYERS)
    qkv_w, qkv_b, o_w, o_b = [], [], [], []
    ln1_g, ln1_b, i_w, i_b, f_w, f_b, ln2_g, ln2_b = ([] for _ in range(8))
    for l in range(NUM_LAYERS):
        lk = jax.random.split(keys[3 + l], 6)
        qw = dense(lk[0], HIDDEN, HIDDEN)
        kw = dense(lk[1], HIDDEN, HIDDEN)
        vw = dense(lk[2], HIDDEN, HIDDEN)
        qkv_w.append(jnp.concatenate([qw, kw, vw], axis=1))                # (H, 3H) merged
        qkv_b.append(jnp.zeros((1, 3 * HIDDEN), jnp.float32))
        o_w.append(dense(lk[3], HIDDEN, HIDDEN))
        o_b.append(jnp.zeros((1, HIDDEN), jnp.float32))
        i_w.append(dense(lk[4], HIDDEN, INTERMEDIATE))
        i_b.append(jnp.zeros((1, INTERMEDIATE), jnp.float32))
        f_w.append(dense(lk[5], INTERMEDIATE, HIDDEN))
        f_b.append(jnp.zeros((1, HIDDEN), jnp.float32))
        ln1_g.append(jnp.ones((1, HIDDEN), jnp.float32))
        ln1_b.append(jnp.zeros((1, HIDDEN), jnp.float32))
        ln2_g.append(jnp.ones((1, HIDDEN), jnp.float32))
        ln2_b.append(jnp.zeros((1, HIDDEN), jnp.float32))

    return {
        "word_emb": 0.02 * jax.random.normal(keys[0], (VOCAB, HIDDEN), jnp.float32),
        "type_emb": 0.02 * jax.random.normal(keys[1], (TYPE_VOCAB, HIDDEN), jnp.float32),
        "emb_ln_g": jnp.ones((1, HIDDEN), jnp.float32),
        "emb_ln_b": jnp.zeros((1, HIDDEN), jnp.float32),
        "rel_emb": 0.02 * jax.random.normal(keys[2], (2 * MAX_REL, HIDDEN), jnp.float32),
        "rel_ln_g": jnp.ones((1, HIDDEN), jnp.float32),
        "rel_ln_b": jnp.zeros((1, HIDDEN), jnp.float32),
        "qkv_w": jnp.stack(qkv_w), "qkv_b": jnp.stack(qkv_b),      # (L, H, 3H), (L, 1, 3H)
        "o_w": jnp.stack(o_w), "o_b": jnp.stack(o_b),              # (L, H, H),  (L, 1, H)
        "ln1_g": jnp.stack(ln1_g), "ln1_b": jnp.stack(ln1_b),      # (L, 1, H)
        "i_w": jnp.stack(i_w), "i_b": jnp.stack(i_b),              # (L, H, I),  (L, 1, I)
        "f_w": jnp.stack(f_w), "f_b": jnp.stack(f_b),              # (L, I, H),  (L, 1, H)
        "ln2_g": jnp.stack(ln2_g), "ln2_b": jnp.stack(ln2_b),      # (L, 1, H)
    }


# --------------------------------- main ---------------------------------------

if __name__ == "__main__":
    root = jax.random.PRNGKey(0)
    pkey, ikey = jax.random.split(root)
    params = init_params(pkey)

    # Synthetic "tokenizer output" for a short sentence (batch=1, seq=SEQ).
    input_ids = jax.random.randint(ikey, (1, SEQ), 0, VOCAB, dtype=jnp.int32)
    token_type_ids = jnp.zeros((1, SEQ), jnp.int32)
    attention_mask = jnp.ones((1, SEQ), jnp.int32)

    out = ort_deberta_forward(input_ids, token_type_ids, attention_mask, params)
    out = jax.block_until_ready(out)
    assert out.shape == (SEQ, HIDDEN) and out.dtype == jnp.float32
    assert bool(jnp.all(jnp.isfinite(out)))
    print("KERNEL_OK")
</pallas_src>

<mosaic_0001>
module attributes {stable_mosaic.version = 11 : i64} {
  func.func @_deberta_kernel(%arg0: memref<8x1xi32, #tpu.memory_space<vmem>>, %arg1: memref<8x1xi32, #tpu.memory_space<vmem>>, %arg2: memref<8x1xf32, #tpu.memory_space<vmem>>, %arg3: memref<1x8xf32, #tpu.memory_space<vmem>>, %arg4: memref<64x16xf32, #tpu.memory_space<vmem>>, %arg5: memref<128x64xf32, #tpu.memory_space<vmem>>, %arg6: memref<2x64xf32, #tpu.memory_space<vmem>>, %arg7: memref<1x64xf32, #tpu.memory_space<vmem>>, %arg8: memref<1x64xf32, #tpu.memory_space<vmem>>, %arg9: memref<16x64xf32, #tpu.memory_space<vmem>>, %arg10: memref<1x64xf32, #tpu.memory_space<vmem>>, %arg11: memref<1x64xf32, #tpu.memory_space<vmem>>, %arg12: memref<1x64x192xf32, #tpu.memory_space<vmem>>, %arg13: memref<1x1x192xf32, #tpu.memory_space<vmem>>, %arg14: memref<1x64x64xf32, #tpu.memory_space<vmem>>, %arg15: memref<1x1x64xf32, #tpu.memory_space<vmem>>, %arg16: memref<1x1x64xf32, #tpu.memory_space<vmem>>, %arg17: memref<1x1x64xf32, #tpu.memory_space<vmem>>, %arg18: memref<1x64x128xf32, #tpu.memory_space<vmem>>, %arg19: memref<1x1x128xf32, #tpu.memory_space<vmem>>, %arg20: memref<1x128x64xf32, #tpu.memory_space<vmem>>, %arg21: memref<1x1x64xf32, #tpu.memory_space<vmem>>, %arg22: memref<1x1x64xf32, #tpu.memory_space<vmem>>, %arg23: memref<1x1x64xf32, #tpu.memory_space<vmem>>, %arg24: memref<8x64xf32, #tpu.memory_space<vmem>>) attributes {dimension_semantics = [], scalar_prefetch = 0 : i64, scratch_operands = 0 : i64, tpu.core_type = #tpu.core_type<tc>} {
    %0 = tpu.iota {dimensions = array<i32: 1>} : vector<8x128xi32>
    %c0 = arith.constant 0 : index
    %c0_0 = arith.constant 0 : index
    %1 = vector.load %arg0[%c0, %c0_0] : memref<8x1xi32, #tpu.memory_space<vmem>>, vector<8x1xi32>
    %2 = vector.broadcast %1 : vector<8x1xi32> to vector<8x128xi32>
    %3 = arith.cmpi eq, %2, %0 : vector<8x128xi32>
    %4 = arith.extui %3 : vector<8x128xi1> to vector<8x128xi32>
    %5 = arith.sitofp %4 : vector<8x128xi32> to vector<8x128xf32>
    %c0_1 = arith.constant 0 : index
    %c0_2 = arith.constant 0 : index
    %6 = vector.load %arg5[%c0_1, %c0_2] : memref<128x64xf32, #tpu.memory_space<vmem>>, vector<128x64xf32>
    %cst = arith.constant dense<0.000000e+00> : vector<8x64xf32>
    %7 = tpu.matmul %5, %6, %cst {dimension_numbers = #tpu.dot_dimension_numbers<[1], [0], [0], [1], [0, 0, 1, 1], [], []>} : vector<8x128xf32>, vector<128x64xf32>, vector<8x64xf32> -> vector<8x64xf32>
    %c0_3 = arith.constant 0 : index
    %c0_4 = arith.constant 0 : index
    %8 = vector.load %arg1[%c0_3, %c0_4] : memref<8x1xi32, #tpu.memory_space<vmem>>, vector<8x1xi32>
    %c0_i32 = arith.constant 0 : i32
    %9 = vector.broadcast %c0_i32 : i32 to vector<8x1xi32>
    %10 = arith.cmpi eq, %8, %9 : vector<8x1xi32>
    %11 = arith.extui %10 : vector<8x1xi1> to vector<8x1xi32>
    %12 = arith.sitofp %11 : vector<8x1xi32> to vector<8x1xf32>
    %c0_5 = arith.constant 0 : index
    %c0_6 = arith.constant 0 : index
    %13 = vector.load %arg6[%c0_5, %c0_6] : memref<2x64xf32, #tpu.memory_space<vmem>>, vector<1x64xf32>
    %14 = vector.broadcast %12 : vector<8x1xf32> to vector<8x64xf32>
    %15 = vector.broadcast %13 : vector<1x64xf32> to vector<8x64xf32>
    %16 = arith.mulf %14, %15 : vector<8x64xf32>
    %17 = arith.addf %7, %16 : vector<8x64xf32>
    %c1_i32 = arith.constant 1 : i32
    %18 = vector.broadcast %c1_i32 : i32 to vector<8x1xi32>
    %19 = arith.cmpi eq, %8, %18 : vector<8x1xi32>
    %20 = arith.extui %19 : vector<8x1xi1> to vector<8x1xi32>
    %21 = arith.sitofp %20 : vector<8x1xi32> to vector<8x1xf32>
    %c1 = arith.constant 1 : index
    %c0_7 = arith.constant 0 : index
    %22 = vector.load %arg6[%c1, %c0_7] : memref<2x64xf32, #tpu.memory_space<vmem>>, vector<1x64xf32>
    %23 = vector.broadcast %21 : vector<8x1xf32> to vector<8x64xf32>
    %24 = vector.broadcast %22 : vector<1x64xf32> to vector<8x64xf32>
    %25 = arith.mulf %23, %24 : vector<8x64xf32>
    %26 = arith.addf %17, %25 : vector<8x64xf32>
    %c0_8 = arith.constant 0 : index
    %c0_9 = arith.constant 0 : index
    %27 = vector.load %arg2[%c0_8, %c0_9] : memref<8x1xf32, #tpu.memory_space<vmem>>, vector<8x1xf32>
    %c0_10 = arith.constant 0 : index
    %c0_11 = arith.constant 0 : index
    %28 = vector.load %arg3[%c0_10, %c0_11] : memref<1x8xf32, #tpu.memory_space<vmem>>, vector<1x8xf32>
    %29 = vector.broadcast %27 : vector<8x1xf32> to vector<8x8xf32>
    %30 = vector.broadcast %28 : vector<1x8xf32> to vector<8x8xf32>
    %31 = arith.mulf %29, %30 : vector<8x8xf32>
    %cst_12 = arith.constant 1.000000e+00 : f32
    %32 = vector.broadcast %cst_12 : f32 to vector<8x8xf32>
    %33 = arith.subf %31, %32 : vector<8x8xf32>
    %cst_13 = arith.constant 1.000000e+30 : f32
    %34 = vector.broadcast %cst_13 : f32 to vector<8x8xf32>
    %35 = arith.mulf %33, %34 : vector<8x8xf32>
    %c0_14 = arith.constant 0 : index
    %c0_15 = arith.constant 0 : index
    %36 = vector.load %arg7[%c0_14, %c0_15] : memref<1x64xf32, #tpu.memory_space<vmem>>, vector<1x64xf32>
    %c0_16 = arith.constant 0 : index
    %c0_17 = arith.constant 0 : index
    %37 = vector.load %arg8[%c0_16, %c0_17] : memref<1x64xf32, #tpu.memory_space<vmem>>, vector<1x64xf32>
    %cst_18 = arith.constant dense<0.000000e+00> : vector<8xf32>
    %38 = vector.multi_reduction <add>, %26, %cst_18 [1] : vector<8x64xf32> to vector<8xf32>
    %39 = vector.shape_cast %38 : vector<8xf32> to vector<8x1xf32>
    %cst_19 = arith.constant 6.400000e+01 : f32
    %40 = vector.broadcast %cst_19 : f32 to vector<8x1xf32>
    %41 = arith.divf %39, %40 : vector<8x1xf32>
    %42 = vector.broadcast %41 : vector<8x1xf32> to vector<8x64xf32>
    %43 = arith.subf %26, %42 : vector<8x64xf32>
    %44 = arith.mulf %43, %43 : vector<8x64xf32>
    %cst_20 = arith.constant dense<0.000000e+00> : vector<8xf32>
    %45 = vector.multi_reduction <add>, %44, %cst_20 [1] : vector<8x64xf32> to vector<8xf32>
    %46 = vector.shape_cast %45 : vector<8xf32> to vector<8x1xf32>
    %cst_21 = arith.constant 6.400000e+01 : f32
    %47 = vector.broadcast %cst_21 : f32 to vector<8x1xf32>
    %48 = arith.divf %46, %47 : vector<8x1xf32>
    %49 = vector.broadcast %41 : vector<8x1xf32> to vector<8x64xf32>
    %50 = arith.subf %26, %49 : vector<8x64xf32>
    %cst_22 = arith.constant 1.000000e-07 : f32
    %51 = vector.broadcast %cst_22 : f32 to vector<8x1xf32>
    %52 = arith.addf %48, %51 : vector<8x1xf32>
    %53 = math.rsqrt %52 : vector<8x1xf32>
    %54 = vector.broadcast %53 : vector<8x1xf32> to vector<8x64xf32>
    %55 = arith.mulf %50, %54 : vector<8x64xf32>
    %56 = vector.broadcast %36 : vector<1x64xf32> to vector<8x64xf32>
    %57 = arith.mulf %55, %56 : vector<8x64xf32>
    %58 = vector.broadcast %37 : vector<1x64xf32> to vector<8x64xf32>
    %59 = arith.addf %57, %58 : vector<8x64xf32>
    %60 = vector.broadcast %27 : vector<8x1xf32> to vector<8x64xf32>
    %61 = arith.mulf %59, %60 : vector<8x64xf32>
    %c0_23 = arith.constant 0 : index
    %c0_24 = arith.constant 0 : index
    %62 = vector.load %arg9[%c0_23, %c0_24] : memref<16x64xf32, #tpu.memory_space<vmem>>, vector<16x64xf32>
    %c0_25 = arith.constant 0 : index
    %c0_26 = arith.constant 0 : index
    %63 = vector.load %arg10[%c0_25, %c0_26] : memref<1x64xf32, #tpu.memory_space<vmem>>, vector<1x64xf32>
    %c0_27 = arith.constant 0 : index
    %c0_28 = arith.constant 0 : index
    %64 = vector.load %arg11[%c0_27, %c0_28] : memref<1x64xf32, #tpu.memory_space<vmem>>, vector<1x64xf32>
    %cst_29 = arith.constant dense<0.000000e+00> : vector<16xf32>
    %65 = vector.multi_reduction <add>, %62, %cst_29 [1] : vector<16x64xf32> to vector<16xf32>
    %66 = vector.shape_cast %65 : vector<16xf32> to vector<16x1xf32>
    %cst_30 = arith.constant 6.400000e+01 : f32
    %67 = vector.broadcast %cst_30 : f32 to vector<16x1xf32>
    %68 = arith.divf %66, %67 : vector<16x1xf32>
    %69 = vector.broadcast %68 : vector<16x1xf32> to vector<16x64xf32>
    %70 = arith.subf %62, %69 : vector<16x64xf32>
    %71 = arith.mulf %70, %70 : vector<16x64xf32>
    %cst_31 = arith.constant dense<0.000000e+00> : vector<16xf32>
    %72 = vector.multi_reduction <add>, %71, %cst_31 [1] : vector<16x64xf32> to vector<16xf32>
    %73 = vector.shape_cast %72 : vector<16xf32> to vector<16x1xf32>
    %cst_32 = arith.constant 6.400000e+01 : f32
    %74 = vector.broadcast %cst_32 : f32 to vector<16x1xf32>
    %75 = arith.divf %73, %74 : vector<16x1xf32>
    %76 = vector.broadcast %68 : vector<16x1xf32> to vector<16x64xf32>
    %77 = arith.subf %62, %76 : vector<16x64xf32>
    %cst_33 = arith.constant 1.000000e-07 : f32
    %78 = vector.broadcast %cst_33 : f32 to vector<16x1xf32>
    %79 = arith.addf %75, %78 : vector<16x1xf32>
    %80 = math.rsqrt %79 : vector<16x1xf32>
    %81 = vector.broadcast %80 : vector<16x1xf32> to vector<16x64xf32>
    %82 = arith.mulf %77, %81 : vector<16x64xf32>
    %83 = vector.broadcast %63 : vector<1x64xf32> to vector<16x64xf32>
    %84 = arith.mulf %82, %83 : vector<16x64xf32>
    %85 = vector.broadcast %64 : vector<1x64xf32> to vector<16x64xf32>
    %86 = arith.addf %84, %85 : vector<16x64xf32>
    %c0_34 = arith.constant 0 : index
    %c0_35 = arith.constant 0 : index
    %87 = vector.load %arg4[%c0_34, %c0_35] : memref<64x16xf32, #tpu.memory_space<vmem>>, vector<64x16xf32>
    %88 = tpu.concatenate %61, %86 in 0 : vector<8x64xf32>, vector<16x64xf32> -> vector<24x64xf32>
    %c0_36 = arith.constant 0 : index
    %c0_37 = arith.constant 0 : index
    %c0_38 = arith.constant 0 : index
    %89 = vector.load %arg12[%c0_36, %c0_37, %c0_38] : memref<1x64x192xf32, #tpu.memory_space<vmem>>, vector<1x64x192xf32>
    %90 = vector.shape_cast %89 : vector<1x64x192xf32> to vector<64x192xf32>
    %cst_39 = arith.constant dense<0.000000e+00> : vector<24x192xf32>
    %91 = tpu.matmul %88, %90, %cst_39 {dimension_numbers = #tpu.dot_dimension_numbers<[1], [0], [0], [1], [0, 0, 1, 1], [], []>} : vector<24x64xf32>, vector<64x192xf32>, vector<24x192xf32> -> vector<24x192xf32>
    %c0_40 = arith.constant 0 : index
    %c0_41 = arith.constant 0 : index
    %c0_42 = arith.constant 0 : index
    %92 = vector.load %arg13[%c0_40, %c0_41, %c0_42] : memref<1x1x192xf32, #tpu.memory_space<vmem>>, vector<1x1x192xf32>
    %93 = vector.shape_cast %92 : vector<1x1x192xf32> to vector<1x192xf32>
    %94 = vector.broadcast %93 : vector<1x192xf32> to vector<24x192xf32>
    %95 = arith.addf %91, %94 : vector<24x192xf32>
    %96 = vector.extract_strided_slice %95 {offsets = [0, 0], sizes = [8, 64], strides = [1, 1]} : vector<24x192xf32> to vector<8x64xf32>
    %97 = vector.extract_strided_slice %95 {offsets = [0, 64], sizes = [8, 64], strides = [1, 1]} : vector<24x192xf32> to vector<8x64xf32>
    %98 = vector.extract_strided_slice %95 {offsets = [0, 128], sizes = [8, 64], strides = [1, 1]} : vector<24x192xf32> to vector<8x64xf32>
    %99 = vector.extract_strided_slice %95 {offsets = [8, 0], sizes = [16, 128], strides = [1, 1]} : vector<24x192xf32> to vector<16x128xf32>
    %cst_43 = arith.constant dense<0.000000e+00> : vector<64x128xf32>
    %100 = tpu.matmul %87, %99, %cst_43 {dimension_numbers = #tpu.dot_dimension_numbers<[1], [0], [0], [1], [0, 0, 1, 1], [], []>} : vector<64x16xf32>, vector<16x128xf32>, vector<64x128xf32> -> vector<64x128xf32>
    %101 = vector.shape_cast %100 : vector<64x128xf32> to vector<8x8x128xf32>
    %102 = vector.extract_strided_slice %96 {offsets = [0, 0], sizes = [8, 16], strides = [1, 1]} : vector<8x64xf32> to vector<8x16xf32>
    %103 = vector.extract_strided_slice %97 {offsets = [0, 0], sizes = [8, 16], strides = [1, 1]} : vector<8x64xf32> to vector<8x16xf32>
    %104 = vector.extract_strided_slice %98 {offsets = [0, 0], sizes = [8, 16], strides = [1, 1]} : vector<8x64xf32> to vector<8x16xf32>
    %105 = tpu.transpose %103, [1, 0] : vector<8x16xf32> -> vector<16x8xf32>
    %cst_44 = arith.constant dense<0.000000e+00> : vector<8x8xf32>
    %106 = tpu.matmul %102, %105, %cst_44 {dimension_numbers = #tpu.dot_dimension_numbers<[1], [0], [0], [1], [0, 0, 1, 1], [], []>} : vector<8x16xf32>, vector<16x8xf32>, vector<8x8xf32> -> vector<8x8xf32>
    %107 = vector.extract_strided_slice %101 {offsets = [0, 0, 64], sizes = [8, 8, 16], strides = [1, 1, 1]} : vector<8x8x128xf32> to vector<8x8x16xf32>
    %108 = vector.extract_strided_slice %101 {offsets = [0, 0, 0], sizes = [8, 8, 16], strides = [1, 1, 1]} : vector<8x8x128xf32> to vector<8x8x16xf32>
    %109 = vector.shape_cast %102 : vector<8x16xf32> to vector<8x1x16xf32>
    %110 = vector.broadcast %109 : vector<8x1x16xf32> to vector<8x8x16xf32>
    %111 = arith.mulf %110, %107 : vector<8x8x16xf32>
    %cst_45 = arith.constant dense<0.000000e+00> : vector<8x8xf32>
    %112 = vector.multi_reduction <add>, %111, %cst_45 [2] : vector<8x8x16xf32> to vector<8x8xf32>
    %113 = vector.shape_cast %103 : vector<8x16xf32> to vector<1x8x16xf32>
    %114 = vector.broadcast %113 : vector<1x8x16xf32> to vector<8x8x16xf32>
    %115 = arith.mulf %114, %108 : vector<8x8x16xf32>
    %cst_46 = arith.constant dense<0.000000e+00> : vector<8x8xf32>
    %116 = vector.multi_reduction <add>, %115, %cst_46 [2] : vector<8x8x16xf32> to vector<8x8xf32>
    %117 = arith.addf %106, %112 : vector<8x8xf32>
    %118 = arith.addf %117, %116 : vector<8x8xf32>
    %cst_47 = arith.constant 0.144337565 : f32
    %119 = vector.broadcast %cst_47 : f32 to vector<8x8xf32>
    %120 = arith.mulf %118, %119 : vector<8x8xf32>
    %121 = arith.addf %120, %35 : vector<8x8xf32>
    %cst_48 = arith.constant dense<0xFF800000> : vector<8xf32>
    %122 = vector.multi_reduction <maximumf>, %121, %cst_48 [1] : vector<8x8xf32> to vector<8xf32>
    %123 = vector.shape_cast %122 : vector<8xf32> to vector<8x1xf32>
    %124 = vector.broadcast %123 : vector<8x1xf32> to vector<8x8xf32>
    %125 = arith.subf %121, %124 : vector<8x8xf32>
    %126 = math.exp %125 : vector<8x8xf32>
    %127 = arith.mulf %126, %31 : vector<8x8xf32>
    %cst_49 = arith.constant dense<0.000000e+00> : vector<8xf32>
    %128 = vector.multi_reduction <add>, %127, %cst_49 [1] : vector<8x8xf32> to vector<8xf32>
    %129 = vector.shape_cast %128 : vector<8xf32> to vector<8x1xf32>
    %cst_50 = arith.constant 1.000000e-30 : f32
    %130 = vector.broadcast %cst_50 : f32 to vector<8x1xf32>
    %131 = arith.maximumf %129, %130 : vector<8x1xf32>
    %132 = vector.broadcast %131 : vector<8x1xf32> to vector<8x8xf32>
    %133 = arith.divf %127, %132 : vector<8x8xf32>
    %cst_51 = arith.constant dense<0.000000e+00> : vector<8x16xf32>
    %134 = tpu.matmul %133, %104, %cst_51 {dimension_numbers = #tpu.dot_dimension_numbers<[1], [0], [0], [1], [0, 0, 1, 1], [], []>} : vector<8x8xf32>, vector<8x16xf32>, vector<8x16xf32> -> vector<8x16xf32>
    %135 = vector.extract_strided_slice %96 {offsets = [0, 16], sizes = [8, 16], strides = [1, 1]} : vector<8x64xf32> to vector<8x16xf32>
    %136 = vector.extract_strided_slice %97 {offsets = [0, 16], sizes = [8, 16], strides = [1, 1]} : vector<8x64xf32> to vector<8x16xf32>
    %137 = vector.extract_strided_slice %98 {offsets = [0, 16], sizes = [8, 16], strides = [1, 1]} : vector<8x64xf32> to vector<8x16xf32>
    %138 = tpu.transpose %136, [1, 0] : vector<8x16xf32> -> vector<16x8xf32>
    %cst_52 = arith.constant dense<0.000000e+00> : vector<8x8xf32>
    %139 = tpu.matmul %135, %138, %cst_52 {dimension_numbers = #tpu.dot_dimension_numbers<[1], [0], [0], [1], [0, 0, 1, 1], [], []>} : vector<8x16xf32>, vector<16x8xf32>, vector<8x8xf32> -> vector<8x8xf32>
    %140 = vector.extract_strided_slice %101 {offsets = [0, 0, 80], sizes = [8, 8, 16], strides = [1, 1, 1]} : vector<8x8x128xf32> to vector<8x8x16xf32>
    %141 = vector.extract_strided_slice %101 {offsets = [0, 0, 16], sizes = [8, 8, 16], strides = [1, 1, 1]} : vector<8x8x128xf32> to vector<8x8x16xf32>
    %142 = vector.shape_cast %135 : vector<8x16xf32> to vector<8x1x16xf32>
    %143 = vector.broadcast %142 : vector<8x1x16xf32> to vector<8x8x16xf32>
    %144 = arith.mulf %143, %140 : vector<8x8x16xf32>
    %cst_53 = arith.constant dense<0.000000e+00> : vector<8x8xf32>
    %145 = vector.multi_reduction <add>, %144, %cst_53 [2] : vector<8x8x16xf32> to vector<8x8xf32>
    %146 = vector.shape_cast %136 : vector<8x16xf32> to vector<1x8x16xf32>
    %147 = vector.broadcast %146 : vector<1x8x16xf32> to vector<8x8x16xf32>
    %148 = arith.mulf %147, %141 : vector<8x8x16xf32>
    %cst_54 = arith.constant dense<0.000000e+00> : vector<8x8xf32>
    %149 = vector.multi_reduction <add>, %148, %cst_54 [2] : vector<8x8x16xf32> to vector<8x8xf32>
    %150 = arith.addf %139, %145 : vector<8x8xf32>
    %151 = arith.addf %150, %149 : vector<8x8xf32>
    %cst_55 = arith.constant 0.144337565 : f32
    %152 = vector.broadcast %cst_55 : f32 to vector<8x8xf32>
    %153 = arith.mulf %151, %152 : vector<8x8xf32>
    %154 = arith.addf %153, %35 : vector<8x8xf32>
    %cst_56 = arith.constant dense<0xFF800000> : vector<8xf32>
    %155 = vector.multi_reduction <maximumf>, %154, %cst_56 [1] : vector<8x8xf32> to vector<8xf32>
    %156 = vector.shape_cast %155 : vector<8xf32> to vector<8x1xf32>
    %157 = vector.broadcast %156 : vector<8x1xf32> to vector<8x8xf32>
    %158 = arith.subf %154, %157 : vector<8x8xf32>
    %159 = math.exp %158 : vector<8x8xf32>
    %160 = arith.mulf %159, %31 : vector<8x8xf32>
    %cst_57 = arith.constant dense<0.000000e+00> : vector<8xf32>
    %161 = vector.multi_reduction <add>, %160, %cst_57 [1] : vector<8x8xf32> to vector<8xf32>
    %162 = vector.shape_cast %161 : vector<8xf32> to vector<8x1xf32>
    %cst_58 = arith.constant 1.000000e-30 : f32
    %163 = vector.broadcast %cst_58 : f32 to vector<8x1xf32>
    %164 = arith.maximumf %162, %163 : vector<8x1xf32>
    %165 = vector.broadcast %164 : vector<8x1xf32> to vector<8x8xf32>
    %166 = arith.divf %160, %165 : vector<8x8xf32>
    %cst_59 = arith.constant dense<0.000000e+00> : vector<8x16xf32>
    %167 = tpu.matmul %166, %137, %cst_59 {dimension_numbers = #tpu.dot_dimension_numbers<[1], [0], [0], [1], [0, 0, 1, 1], [], []>} : vector<8x8xf32>, vector<8x16xf32>, vector<8x16xf32> -> vector<8x16xf32>
    %168 = vector.extract_strided_slice %96 {offsets = [0, 32], sizes = [8, 16], strides = [1, 1]} : vector<8x64xf32> to vector<8x16xf32>
    %169 = vector.extract_strided_slice %97 {offsets = [0, 32], sizes = [8, 16], strides = [1, 1]} : vector<8x64xf32> to vector<8x16xf32>
    %170 = vector.extract_strided_slice %98 {offsets = [0, 32], sizes = [8, 16], strides = [1, 1]} : vector<8x64xf32> to vector<8x16xf32>
    %171 = tpu.transpose %169, [1, 0] : vector<8x16xf32> -> vector<16x8xf32>
    %cst_60 = arith.constant dense<0.000000e+00> : vector<8x8xf32>
    %172 = tpu.matmul %168, %171, %cst_60 {dimension_numbers = #tpu.dot_dimension_numbers<[1], [0], [0], [1], [0, 0, 1, 1], [], []>} : vector<8x16xf32>, vector<16x8xf32>, vector<8x8xf32> -> vector<8x8xf32>
    %173 = vector.extract_strided_slice %101 {offsets = [0, 0, 96], sizes = [8, 8, 16], strides = [1, 1, 1]} : vector<8x8x128xf32> to vector<8x8x16xf32>
    %174 = vector.extract_strided_slice %101 {offsets = [0, 0, 32], sizes = [8, 8, 16], strides = [1, 1, 1]} : vector<8x8x128xf32> to vector<8x8x16xf32>
    %175 = vector.shape_cast %168 : vector<8x16xf32> to vector<8x1x16xf32>
    %176 = vector.broadcast %175 : vector<8x1x16xf32> to vector<8x8x16xf32>
    %177 = arith.mulf %176, %173 : vector<8x8x16xf32>
    %cst_61 = arith.constant dense<0.000000e+00> : vector<8x8xf32>
    %178 = vector.multi_reduction <add>, %177, %cst_61 [2] : vector<8x8x16xf32> to vector<8x8xf32>
    %179 = vector.shape_cast %169 : vector<8x16xf32> to vector<1x8x16xf32>
    %180 = vector.broadcast %179 : vector<1x8x16xf32> to vector<8x8x16xf32>
    %181 = arith.mulf %180, %174 : vector<8x8x16xf32>
    %cst_62 = arith.constant dense<0.000000e+00> : vector<8x8xf32>
    %182 = vector.multi_reduction <add>, %181, %cst_62 [2] : vector<8x8x16xf32> to vector<8x8xf32>
    %183 = arith.addf %172, %178 : vector<8x8xf32>
    %184 = arith.addf %183, %182 : vector<8x8xf32>
    %cst_63 = arith.constant 0.144337565 : f32
    %185 = vector.broadcast %cst_63 : f32 to vector<8x8xf32>
    %186 = arith.mulf %184, %185 : vector<8x8xf32>
    %187 = arith.addf %186, %35 : vector<8x8xf32>
    %cst_64 = arith.constant dense<0xFF800000> : vector<8xf32>
    %188 = vector.multi_reduction <maximumf>, %187, %cst_64 [1] : vector<8x8xf32> to vector<8xf32>
    %189 = vector.shape_cast %188 : vector<8xf32> to vector<8x1xf32>
    %190 = vector.broadcast %189 : vector<8x1xf32> to vector<8x8xf32>
    %191 = arith.subf %187, %190 : vector<8x8xf32>
    %192 = math.exp %191 : vector<8x8xf32>
    %193 = arith.mulf %192, %31 : vector<8x8xf32>
    %cst_65 = arith.constant dense<0.000000e+00> : vector<8xf32>
    %194 = vector.multi_reduction <add>, %193, %cst_65 [1] : vector<8x8xf32> to vector<8xf32>
    %195 = vector.shape_cast %194 : vector<8xf32> to vector<8x1xf32>
    %cst_66 = arith.constant 1.000000e-30 : f32
    %196 = vector.broadcast %cst_66 : f32 to vector<8x1xf32>
    %197 = arith.maximumf %195, %196 : vector<8x1xf32>
    %198 = vector.broadcast %197 : vector<8x1xf32> to vector<8x8xf32>
    %199 = arith.divf %193, %198 : vector<8x8xf32>
    %cst_67 = arith.constant dense<0.000000e+00> : vector<8x16xf32>
    %200 = tpu.matmul %199, %170, %cst_67 {dimension_numbers = #tpu.dot_dimension_numbers<[1], [0], [0], [1], [0, 0, 1, 1], [], []>} : vector<8x8xf32>, vector<8x16xf32>, vector<8x16xf32> -> vector<8x16xf32>
    %201 = vector.extract_strided_slice %96 {offsets = [0, 48], sizes = [8, 16], strides = [1, 1]} : vector<8x64xf32> to vector<8x16xf32>
    %202 = vector.extract_strided_slice %97 {offsets = [0, 48], sizes = [8, 16], strides = [1, 1]} : vector<8x64xf32> to vector<8x16xf32>
    %203 = vector.extract_strided_slice %98 {offsets = [0, 48], sizes = [8, 16], strides = [1, 1]} : vector<8x64xf32> to vector<8x16xf32>
    %204 = tpu.transpose %202, [1, 0] : vector<8x16xf32> -> vector<16x8xf32>
    %cst_68 = arith.constant dense<0.000000e+00> : vector<8x8xf32>
    %205 = tpu.matmul %201, %204, %cst_68 {dimension_numbers = #tpu.dot_dimension_numbers<[1], [0], [0], [1], [0, 0, 1, 1], [], []>} : vector<8x16xf32>, vector<16x8xf32>, vector<8x8xf32> -> vector<8x8xf32>
    %206 = vector.extract_strided_slice %101 {offsets = [0, 0, 112], sizes = [8, 8, 16], strides = [1, 1, 1]} : vector<8x8x128xf32> to vector<8x8x16xf32>
    %207 = vector.extract_strided_slice %101 {offsets = [0, 0, 48], sizes = [8, 8, 16], strides = [1, 1, 1]} : vector<8x8x128xf32> to vector<8x8x16xf32>
    %208 = vector.shape_cast %201 : vector<8x16xf32> to vector<8x1x16xf32>
    %209 = vector.broadcast %208 : vector<8x1x16xf32> to vector<8x8x16xf32>
    %210 = arith.mulf %209, %206 : vector<8x8x16xf32>
    %cst_69 = arith.constant dense<0.000000e+00> : vector<8x8xf32>
    %211 = vector.multi_reduction <add>, %210, %cst_69 [2] : vector<8x8x16xf32> to vector<8x8xf32>
    %212 = vector.shape_cast %202 : vector<8x16xf32> to vector<1x8x16xf32>
    %213 = vector.broadcast %212 : vector<1x8x16xf32> to vector<8x8x16xf32>
    %214 = arith.mulf %213, %207 : vector<8x8x16xf32>
    %cst_70 = arith.constant dense<0.000000e+00> : vector<8x8xf32>
    %215 = vector.multi_reduction <add>, %214, %cst_70 [2] : vector<8x8x16xf32> to vector<8x8xf32>
    %216 = arith.addf %205, %211 : vector<8x8xf32>
    %217 = arith.addf %216, %215 : vector<8x8xf32>
    %cst_71 = arith.constant 0.144337565 : f32
    %218 = vector.broadcast %cst_71 : f32 to vector<8x8xf32>
    %219 = arith.mulf %217, %218 : vector<8x8xf32>
    %220 = arith.addf %219, %35 : vector<8x8xf32>
    %cst_72 = arith.constant dense<0xFF800000> : vector<8xf32>
    %221 = vector.multi_reduction <maximumf>, %220, %cst_72 [1] : vector<8x8xf32> to vector<8xf32>
    %222 = vector.shape_cast %221 : vector<8xf32> to vector<8x1xf32>
    %223 = vector.broadcast %222 : vector<8x1xf32> to vector<8x8xf32>
    %224 = arith.subf %220, %223 : vector<8x8xf32>
    %225 = math.exp %224 : vector<8x8xf32>
    %226 = arith.mulf %225, %31 : vector<8x8xf32>
    %cst_73 = arith.constant dense<0.000000e+00> : vector<8xf32>
    %227 = vector.multi_reduction <add>, %226, %cst_73 [1] : vector<8x8xf32> to vector<8xf32>
    %228 = vector.shape_cast %227 : vector<8xf32> to vector<8x1xf32>
    %cst_74 = arith.constant 1.000000e-30 : f32
    %229 = vector.broadcast %cst_74 : f32 to vector<8x1xf32>
    %230 = arith.maximumf %228, %229 : vector<8x1xf32>
    %231 = vector.broadcast %230 : vector<8x1xf32> to vector<8x8xf32>
    %232 = arith.divf %226, %231 : vector<8x8xf32>
    %cst_75 = arith.constant dense<0.000000e+00> : vector<8x16xf32>
    %233 = tpu.matmul %232, %203, %cst_75 {dimension_numbers = #tpu.dot_dimension_numbers<[1], [0], [0], [1], [0, 0, 1, 1], [], []>} : vector<8x8xf32>, vector<8x16xf32>, vector<8x16xf32> -> vector<8x16xf32>
    %234 = tpu.concatenate %134, %167, %200, %233 in 1 : vector<8x16xf32>, vector<8x16xf32>, vector<8x16xf32>, vector<8x16xf32> -> vector<8x64xf32>
    %c0_76 = arith.constant 0 : index
    %c0_77 = arith.constant 0 : index
    %c0_78 = arith.constant 0 : index
    %235 = vector.load %arg14[%c0_76, %c0_77, %c0_78] : memref<1x64x64xf32, #tpu.memory_space<vmem>>, vector<1x64x64xf32>
    %236 = vector.shape_cast %235 : vector<1x64x64xf32> to vector<64x64xf32>
    %cst_79 = arith.constant dense<0.000000e+00> : vector<8x64xf32>
    %237 = tpu.matmul %234, %236, %cst_79 {dimension_numbers = #tpu.dot_dimension_numbers<[1], [0], [0], [1], [0, 0, 1, 1], [], []>} : vector<8x64xf32>, vector<64x64xf32>, vector<8x64xf32> -> vector<8x64xf32>
    %c0_80 = arith.constant 0 : index
    %c0_81 = arith.constant 0 : index
    %c0_82 = arith.constant 0 : index
    %238 = vector.load %arg15[%c0_80, %c0_81, %c0_82] : memref<1x1x64xf32, #tpu.memory_space<vmem>>, vector<1x1x64xf32>
    %239 = vector.shape_cast %238 : vector<1x1x64xf32> to vector<1x64xf32>
    %240 = vector.broadcast %239 : vector<1x64xf32> to vector<8x64xf32>
    %241 = arith.addf %237, %240 : vector<8x64xf32>
    %242 = arith.addf %241, %61 : vector<8x64xf32>
    %c0_83 = arith.constant 0 : index
    %c0_84 = arith.constant 0 : index
    %c0_85 = arith.constant 0 : index
    %243 = vector.load %arg16[%c0_83, %c0_84, %c0_85] : memref<1x1x64xf32, #tpu.memory_space<vmem>>, vector<1x1x64xf32>
    %244 = vector.shape_cast %243 : vector<1x1x64xf32> to vector<1x64xf32>
    %c0_86 = arith.constant 0 : index
    %c0_87 = arith.constant 0 : index
    %c0_88 = arith.constant 0 : index
    %245 = vector.load %arg17[%c0_86, %c0_87, %c0_88] : memref<1x1x64xf32, #tpu.memory_space<vmem>>, vector<1x1x64xf32>
    %246 = vector.shape_cast %245 : vector<1x1x64xf32> to vector<1x64xf32>
    %cst_89 = arith.constant dense<0.000000e+00> : vector<8xf32>
    %247 = vector.multi_reduction <add>, %242, %cst_89 [1] : vector<8x64xf32> to vector<8xf32>
    %248 = vector.shape_cast %247 : vector<8xf32> to vector<8x1xf32>
    %cst_90 = arith.constant 6.400000e+01 : f32
    %249 = vector.broadcast %cst_90 : f32 to vector<8x1xf32>
    %250 = arith.divf %248, %249 : vector<8x1xf32>
    %251 = vector.broadcast %250 : vector<8x1xf32> to vector<8x64xf32>
    %252 = arith.subf %242, %251 : vector<8x64xf32>
    %253 = arith.mulf %252, %252 : vector<8x64xf32>
    %cst_91 = arith.constant dense<0.000000e+00> : vector<8xf32>
    %254 = vector.multi_reduction <add>, %253, %cst_91 [1] : vector<8x64xf32> to vector<8xf32>
    %255 = vector.shape_cast %254 : vector<8xf32> to vector<8x1xf32>
    %cst_92 = arith.constant 6.400000e+01 : f32
    %256 = vector.broadcast %cst_92 : f32 to vector<8x1xf32>
    %257 = arith.divf %255, %256 : vector<8x1xf32>
    %258 = vector.broadcast %250 : vector<8x1xf32> to vector<8x64xf32>
    %259 = arith.subf %242, %258 : vector<8x64xf32>
    %cst_93 = arith.constant 1.000000e-07 : f32
    %260 = vector.broadcast %cst_93 : f32 to vector<8x1xf32>
    %261 = arith.addf %257, %260 : vector<8x1xf32>
    %262 = math.rsqrt %261 : vector<8x1xf32>
    %263 = vector.broadcast %262 : vector<8x1xf32> to vector<8x64xf32>
    %264 = arith.mulf %259, %263 : vector<8x64xf32>
    %265 = vector.broadcast %244 : vector<1x64xf32> to vector<8x64xf32>
    %266 = arith.mulf %264, %265 : vector<8x64xf32>
    %267 = vector.broadcast %246 : vector<1x64xf32> to vector<8x64xf32>
    %268 = arith.addf %266, %267 : vector<8x64xf32>
    %c0_94 = arith.constant 0 : index
    %c0_95 = arith.constant 0 : index
    %c0_96 = arith.constant 0 : index
    %269 = vector.load %arg18[%c0_94, %c0_95, %c0_96] : memref<1x64x128xf32, #tpu.memory_space<vmem>>, vector<1x64x128xf32>
    %270 = vector.shape_cast %269 : vector<1x64x128xf32> to vector<64x128xf32>
    %cst_97 = arith.constant dense<0.000000e+00> : vector<8x128xf32>
    %271 = tpu.matmul %268, %270, %cst_97 {dimension_numbers = #tpu.dot_dimension_numbers<[1], [0], [0], [1], [0, 0, 1, 1], [], []>} : vector<8x64xf32>, vector<64x128xf32>, vector<8x128xf32> -> vector<8x128xf32>
    %c0_98 = arith.constant 0 : index
    %c0_99 = arith.constant 0 : index
    %c0_100 = arith.constant 0 : index
    %272 = vector.load %arg19[%c0_98, %c0_99, %c0_100] : memref<1x1x128xf32, #tpu.memory_space<vmem>>, vector<1x1x128xf32>
    %273 = vector.shape_cast %272 : vector<1x1x128xf32> to vector<1x128xf32>
    %274 = vector.broadcast %273 : vector<1x128xf32> to vector<8x128xf32>
    %275 = arith.addf %271, %274 : vector<8x128xf32>
    %cst_101 = arith.constant 5.000000e-01 : f32
    %276 = vector.broadcast %cst_101 : f32 to vector<8x128xf32>
    %277 = arith.mulf %276, %275 : vector<8x128xf32>
    %cst_102 = arith.constant 0.707106769 : f32
    %278 = vector.broadcast %cst_102 : f32 to vector<8x128xf32>
    %279 = arith.mulf %275, %278 : vector<8x128xf32>
    %280 = math.absf %279 : vector<8x128xf32>
    %cst_103 = arith.constant 0.327591091 : f32
    %281 = vector.broadcast %cst_103 : f32 to vector<8x128xf32>
    %282 = arith.mulf %281, %280 : vector<8x128xf32>
    %cst_104 = arith.constant 1.000000e+00 : f32
    %283 = vector.broadcast %cst_104 : f32 to vector<8x128xf32>
    %284 = arith.addf %283, %282 : vector<8x128xf32>
    %cst_105 = arith.constant 1.000000e+00 : f32
    %285 = vector.broadcast %cst_105 : f32 to vector<8x128xf32>
    %286 = arith.divf %285, %284 : vector<8x128xf32>
    %cst_106 = arith.constant 1.06140542 : f32
    %287 = vector.broadcast %cst_106 : f32 to vector<8x128xf32>
    %288 = arith.mulf %287, %286 : vector<8x128xf32>
    %cst_107 = arith.constant -1.45315206 : f32
    %289 = vector.broadcast %cst_107 : f32 to vector<8x128xf32>
    %290 = arith.addf %288, %289 : vector<8x128xf32>
    %291 = arith.mulf %290, %286 : vector<8x128xf32>
    %cst_108 = arith.constant 1.42141378 : f32
    %292 = vector.broadcast %cst_108 : f32 to vector<8x128xf32>
    %293 = arith.addf %291, %292 : vector<8x128xf32>
    %294 = arith.mulf %293, %286 : vector<8x128xf32>
    %cst_109 = arith.constant -0.284496725 : f32
    %295 = vector.broadcast %cst_109 : f32 to vector<8x128xf32>
    %296 = arith.addf %294, %295 : vector<8x128xf32>
    %297 = arith.mulf %296, %286 : vector<8x128xf32>
    %cst_110 = arith.constant 0.254829586 : f32
    %298 = vector.broadcast %cst_110 : f32 to vector<8x128xf32>
    %299 = arith.addf %297, %298 : vector<8x128xf32>
    %300 = arith.mulf %299, %286 : vector<8x128xf32>
    %cst_111 = arith.constant 0.000000e+00 : f32
    %301 = vector.broadcast %cst_111 : f32 to vector<8x128xf32>
    %302 = arith.subf %301, %280 : vector<8x128xf32>
    %303 = arith.mulf %302, %280 : vector<8x128xf32>
    %304 = math.exp %303 : vector<8x128xf32>
    %305 = arith.mulf %300, %304 : vector<8x128xf32>
    %cst_112 = arith.constant 1.000000e+00 : f32
    %306 = vector.broadcast %cst_112 : f32 to vector<8x128xf32>
    %307 = arith.subf %306, %305 : vector<8x128xf32>
    %cst_113 = arith.constant 0.000000e+00 : f32
    %308 = vector.broadcast %cst_113 : f32 to vector<8x128xf32>
    %309 = arith.cmpf olt, %279, %308 : vector<8x128xf32>
    %cst_114 = arith.constant 0.000000e+00 : f32
    %310 = vector.broadcast %cst_114 : f32 to vector<8x128xf32>
    %311 = arith.subf %310, %307 : vector<8x128xf32>
    %312 = arith.select %309, %311, %307 : vector<8x128xi1>, vector<8x128xf32>
    %cst_115 = arith.constant 1.000000e+00 : f32
    %313 = vector.broadcast %cst_115 : f32 to vector<8x128xf32>
    %314 = arith.addf %313, %312 : vector<8x128xf32>
    %315 = arith.mulf %277, %314 : vector<8x128xf32>
    %c0_116 = arith.constant 0 : index
    %c0_117 = arith.constant 0 : index
    %c0_118 = arith.constant 0 : index
    %316 = vector.load %arg20[%c0_116, %c0_117, %c0_118] : memref<1x128x64xf32, #tpu.memory_space<vmem>>, vector<1x128x64xf32>
    %317 = vector.shape_cast %316 : vector<1x128x64xf32> to vector<128x64xf32>
    %cst_119 = arith.constant dense<0.000000e+00> : vector<8x64xf32>
    %318 = tpu.matmul %315, %317, %cst_119 {dimension_numbers = #tpu.dot_dimension_numbers<[1], [0], [0], [1], [0, 0, 1, 1], [], []>} : vector<8x128xf32>, vector<128x64xf32>, vector<8x64xf32> -> vector<8x64xf32>
    %c0_120 = arith.constant 0 : index
    %c0_121 = arith.constant 0 : index
    %c0_122 = arith.constant 0 : index
    %319 = vector.load %arg21[%c0_120, %c0_121, %c0_122] : memref<1x1x64xf32, #tpu.memory_space<vmem>>, vector<1x1x64xf32>
    %320 = vector.shape_cast %319 : vector<1x1x64xf32> to vector<1x64xf32>
    %321 = vector.broadcast %320 : vector<1x64xf32> to vector<8x64xf32>
    %322 = arith.addf %318, %321 : vector<8x64xf32>
    %323 = arith.addf %322, %268 : vector<8x64xf32>
    %c0_123 = arith.constant 0 : index
    %c0_124 = arith.constant 0 : index
    %c0_125 = arith.constant 0 : index
    %324 = vector.load %arg22[%c0_123, %c0_124, %c0_125] : memref<1x1x64xf32, #tpu.memory_space<vmem>>, vector<1x1x64xf32>
    %325 = vector.shape_cast %324 : vector<1x1x64xf32> to vector<1x64xf32>
    %c0_126 = arith.constant 0 : index
    %c0_127 = arith.constant 0 : index
    %c0_128 = arith.constant 0 : index
    %326 = vector.load %arg23[%c0_126, %c0_127, %c0_128] : memref<1x1x64xf32, #tpu.memory_space<vmem>>, vector<1x1x64xf32>
    %327 = vector.shape_cast %326 : vector<1x1x64xf32> to vector<1x64xf32>
    %cst_129 = arith.constant dense<0.000000e+00> : vector<8xf32>
    %328 = vector.multi_reduction <add>, %323, %cst_129 [1] : vector<8x64xf32> to vector<8xf32>
    %329 = vector.shape_cast %328 : vector<8xf32> to vector<8x1xf32>
    %cst_130 = arith.constant 6.400000e+01 : f32
    %330 = vector.broadcast %cst_130 : f32 to vector<8x1xf32>
    %331 = arith.divf %329, %330 : vector<8x1xf32>
    %332 = vector.broadcast %331 : vector<8x1xf32> to vector<8x64xf32>
    %333 = arith.subf %323, %332 : vector<8x64xf32>
    %334 = arith.mulf %333, %333 : vector<8x64xf32>
    %cst_131 = arith.constant dense<0.000000e+00> : vector<8xf32>
    %335 = vector.multi_reduction <add>, %334, %cst_131 [1] : vector<8x64xf32> to vector<8xf32>
    %336 = vector.shape_cast %335 : vector<8xf32> to vector<8x1xf32>
    %cst_132 = arith.constant 6.400000e+01 : f32
    %337 = vector.broadcast %cst_132 : f32 to vector<8x1xf32>
    %338 = arith.divf %336, %337 : vector<8x1xf32>
    %339 = vector.broadcast %331 : vector<8x1xf32> to vector<8x64xf32>
    %340 = arith.subf %323, %339 : vector<8x64xf32>
    %cst_133 = arith.constant 1.000000e-07 : f32
    %341 = vector.broadcast %cst_133 : f32 to vector<8x1xf32>
    %342 = arith.addf %338, %341 : vector<8x1xf32>
    %343 = math.rsqrt %342 : vector<8x1xf32>
    %344 = vector.broadcast %343 : vector<8x1xf32> to vector<8x64xf32>
    %345 = arith.mulf %340, %344 : vector<8x64xf32>
    %346 = vector.broadcast %325 : vector<1x64xf32> to vector<8x64xf32>
    %347 = arith.mulf %345, %346 : vector<8x64xf32>
    %348 = vector.broadcast %327 : vector<1x64xf32> to vector<8x64xf32>
    %349 = arith.addf %347, %348 : vector<8x64xf32>
    %c0_134 = arith.constant 0 : index
    %c0_135 = arith.constant 0 : index
    %350 = vector.load %arg24[%c0_134, %c0_135] : memref<8x64xf32, #tpu.memory_space<vmem>>, vector<8x64xf32>
    tpu.vector_store %arg24[%c0_134, %c0_135], %349 {strides = array<i32>} : memref<8x64xf32, #tpu.memory_space<vmem>>, vector<8x64xf32>,
    return
  }
}

</mosaic_0001>

<bundles_post_ra>
// kernel: ort_deberta_forward.1
= control target key start
LH: loop header
LB: loop body
LE: loop exit
PB: predicated region body
PF: predicated region fallthrough
CT: control target
= control target key end

     0   :  { %s3932_s0 = inlined_call_operand.vmem [shape: s32[8,1], index: 0, kind: input, shape index: {}]   ;;  %s3933_s1 = inlined_call_operand.vmem [shape: s32[8,1], index: 1, kind: input, shape index: {}]   ;;  %s3934_s2 = inlined_call_operand.vmem [shape: f32[8,1], index: 2, kind: input, shape index: {}]   ;;  %s3935_s3 = inlined_call_operand.vmem [shape: f32[1,8], index: 3, kind: input, shape index: {}]   ;;  %s3936_s4 = inlined_call_operand.vmem [shape: f32[64,16], index: 4, kind: input, shape index: {}]   ;;  %s3937_s5 = inlined_call_operand.vmem [shape: f32[128,64], index: 5, kind: input, shape index: {}]   ;;  %s3938_s6 = inlined_call_operand.vmem [shape: f32[2,64], index: 6, kind: input, shape index: {}]   ;;  %s3939_s7 = inlined_call_operand.vmem [shape: f32[1,64], index: 7, kind: input, shape index: {}]   ;;  %s3940_s8 = inlined_call_operand.vmem [shape: f32[1,64], index: 8, kind: input, shape index: {}]   ;;  %s3941_s9 = inlined_call_operand.vmem [shape: f32[16,64], index: 9, kind: input, shape index: {}]   ;;  %s3942_s10 = inlined_call_operand.vmem [shape: f32[1,64], index: 10, kind: input, shape index: {}]   ;;  %s3943_s11 = inlined_call_operand.vmem [shape: f32[1,64], index: 11, kind: input, shape index: {}]   ;;  %s3944_s12 = inlined_call_operand.vmem [shape: f32[1,64,192], index: 12, kind: input, shape index: {}]   ;;  %s3945_s13 = inlined_call_operand.vmem [shape: f32[1,1,192], index: 13, kind: input, shape index: {}]   ;;  %s3946_s14 = inlined_call_operand.vmem [shape: f32[1,64,64], index: 14, kind: input, shape index: {}]   ;;  %s3947_s15 = inlined_call_operand.vmem [shape: f32[1,1,64], index: 15, kind: input, shape index: {}]   ;;  %s3948_s16 = inlined_call_operand.vmem [shape: f32[1,1,64], index: 16, kind: input, shape index: {}]   ;;  %s3949_s17 = inlined_call_operand.vmem [shape: f32[1,1,64], index: 17, kind: input, shape index: {}]   ;;  %s3950_s18 = inlined_call_operand.vmem [shape: f32[1,64,128], index: 18, kind: input, shape index: {}]   ;;  %s3951_s19 = inlined_call_operand.vmem [shape: f32[1,1,128], index: 19, kind: input, shape index: {}]   ;;  %s3952_s20 = inlined_call_operand.vmem [shape: f32[1,128,64], index: 20, kind: input, shape index: {}]   ;;  %s3953_s21 = inlined_call_operand.vmem [shape: f32[1,1,64], index: 21, kind: input, shape index: {}]   ;;  %s3954_s22 = inlined_call_operand.vmem [shape: f32[1,1,64], index: 22, kind: input, shape index: {}]   ;;  %s3955_s23 = inlined_call_operand.vmem [shape: f32[1,1,64], index: 23, kind: input, shape index: {}]   ;;  %s3956_s24 = inlined_call_operand.hbm [shape: f32[8,64], index: 24, kind: output, shape index: {}]  }
   0x1   :  { %3960 = sst [smem:[#allocation5_spill]] %s3932_s0 }
   0x2   :  { %3961 = sst [smem:[#allocation6_spill]] %s3933_s1 }
   0x3   :  { %3962 = sst [smem:[#allocation7_spill]] %s3934_s2 }
   0x4   :  { %3963 = sst [smem:[#allocation8_spill]] %s3935_s3 }
   0x5   :  { %3964 = sst [smem:[#allocation9_spill]] %s3936_s4 }
   0x6   :  { %3965 = sst [smem:[#allocation10_spill]] %s3937_s5 }
   0x7   :  { %3966 = sst [smem:[#allocation11_spill]] %s3938_s6 }
   0x8   :  { %3967 = sst [smem:[#allocation12_spill]] %s3939_s7 }
   0x9   :  { %3968 = sst [smem:[#allocation13_spill]] %s3940_s8 }
   0xa   :  { %3969 = sst [smem:[#allocation14_spill]] %s3951_s19 }
   0xb   :  { %s3970_s27 = sld [smem:[#allocation5_spill]]  ;;  %v2876_v2 = vmov 0   ;;  %v2877_v3 = vmov 0.0   ;;  %vm2878_vm1 = vmmov 0  }
   0xc   :  { %s3971_s19 = sld [smem:[#allocation6_spill]]  ;;  %2822 = vset.pattern.permute.xlu0 %v2876_v2  ;;  %2645 = vmatprep.subr.mxu0 %v2877_v3 }
   0xd   :  { %s3972_s0 = sld [smem:[#allocation10_spill]]  ;;  %2677 = vmatprep.mubr.msk.f32.mxu0 %vm2878_vm1, %v2877_v3  ;;  %2823 = vset.pattern.permute.xlu1 %v2876_v2 }
   0xe   :  { %406 = vmatprep.mubr.f32.mxu1 %v2877_v3 }
  0x11   :  { %v80_v0 = vld [vmem:[%s3970_s27] sm:$0xff] }
  0x12   :  { %v3020_v1 = vld [vmem:[%s3971_s19] sm:$0xff]  ;;  %82 = vperm.xlu0 %2822, %v80_v0  }
  0x13   :  { %vm104_vm0 = vcmp.eq.s32.totalorder %v3020_v1, 0  ;;  %v102_v4 = vld [vmem:[%s3972_s0 + $0x78] sm:$0xff]  ;;  %v101_v5 = vld [vmem:[%s3972_s0 + $0x70] sm:$0xff]  ;;  %v100_v7 = vld [vmem:[%s3972_s0 + $0x68] sm:$0xff] }
  0x14   :  { %2646 = vmatpush3.msra.mxu0 %v102_v4  ;;  %v2524_v6 = vsel %vm104_vm0, 1.0, %v2877_v3  ;;  %v99_v8 = vld [vmem:[%s3972_s0 + $0x60] sm:$0xff] }
  0x15   :  { %2647 = vmatprep.subr.mxu0 %v2877_v3 }
  0x16   :  { %2648 = vmatpush3.msra.mxu0 %v101_v5  ;;  %110 = vperm.xlu0 %2822, %v2524_v6  }
  0x17   :  { %2649 = vmatprep.subr.mxu0 %v2877_v3 }
  0x18   :  { %2650 = vmatpush3.msra.mxu0 %v100_v7 }
  0x19   :  { %29 = vsyncpa [#allocation3], 0  ;;  %2651 = vmatprep.subr.mxu0 %v2877_v3  ;;  %v98_v9 = vld [vmem:[%s3972_s0 + $0x58] sm:$0xff]  ;;  %v97_v10 = vld [vmem:[%s3972_s0 + $0x50] sm:$0xff]  ;;  %vm221_vm2 = vcmask 523264   ;;  %vm188_vm3 = vcmp.eq.s32.totalorder %v3020_v1, 1  ;;  %v78_v26 = vlaneseq }
  0x1a   :  { %2652 = vmatpush3.msra.mxu0 %v99_v8  ;;  %v96_v11 = vld [vmem:[%s3972_s0 + $0x48] sm:$0xff]  ;;  %v95_v12 = vld [vmem:[%s3972_s0 + $0x40] sm:$0xff]  ;;  %v94_v13 = vld [vmem:[%s3972_s0 + $0x38] sm:$0xff]  ;;  %v2527_v25 = vsel %vm188_vm3, 1.0, %v2877_v3  ;;  %v2879_v29 = vmov 1.0   ;;  %s3973_s25 = sld [smem:[#allocation7_spill]] }
  0x1b   :  { %2653 = vmatprep.subr.mxu0 %v2877_v3  ;;  %v93_v14 = vld [vmem:[%s3972_s0 + $0x30] sm:$0xff]  ;;  %v92_v15 = vld [vmem:[%s3972_s0 + $0x28] sm:$0xff]  ;;  %v91_v16 = vld [vmem:[%s3972_s0 + $0x20] sm:$0xff]  ;;  %194 = vperm.xlu1 %2823, %v2527_v25   ;;  %v3103_v27 = vand.u32 127, %v78_v26  ;;  %s3974_s1 = sld [smem:[#allocation11_spill]]  ;;  %vm423_vm5 = vcmask 130048  }
  0x1c   :  { %2654 = vmatpush3.msra.mxu0 %v98_v9  ;;  %v90_v17 = vld [vmem:[%s3972_s0 + $0x18] sm:$0xff]  ;;  %v89_v18 = vld [vmem:[%s3972_s0 + $0x10] sm:$0xff]  ;;  %v88_v19 = vld [vmem:[%s3972_s0 + $0x8] sm:$0xff]  ;;  %s3976_s6 = sld [smem:[#allocation13_spill]]  ;;  %s2882_s30 = smov 112   ;;  %vm813_vm6 = vcmask 1041409  }
  0x1d   :  { %2655 = vmatprep.subr.mxu0 %v2877_v3  ;;  %v87_v20 = vld [vmem:[%s3972_s0] sm:$0xff]  ;;  %v252_v23 = vld [vmem:[%s3941_s9 + $0x8] sm:$0xff]  ;;  %v320_v57 = vld [vmem:[%s3944_s12 + $0x78] sm:$0xff]  ;;  %s3977_s3 = sld [smem:[#allocation9_spill]]  ;;  %s2880_s0 = smov 64   ;;  %vm815_vm7 = vcmask 1042434  }
  0x1e   :  { %2656 = vmatpush3.msra.mxu0 %v97_v10  ;;  %v251_v21 = vld [vmem:[%s3941_s9] sm:$0xff]  ;;  %v258_v24 = vsel %vm221_vm2, %v252_v23, 0.0  ;;  %v319_v58 = vld [vmem:[%s3944_s12 + $0x70] sm:$0xff]  ;;  %v318_v59 = vld [vmem:[%s3944_s12 + $0x68] sm:$0xff]  ;;  %358 = vmatprep.subr.mxu1 %v320_v57  ;;  %s2884_s19 = smov 16   ;;  %vm817_vm8 = vcmask 1043459  }
  0x1f   :  { %2657 = vmatprep.subr.mxu0 %v2877_v3  ;;  %v255_v22 = vsel %vm221_vm2, %v251_v21, 0.0  ;;  %v317_v60 = vld [vmem:[%s3944_s12 + $0x60] sm:$0xff]  ;;  %359 = vmatpush1.msra.mxu1 %v319_v58  ;;  %v316_v61 = vld [vmem:[%s3944_s12 + $0x58] sm:$0xff]  ;;  %v315_v62 = vld [vmem:[%s3944_s12 + $0x50] sm:$0xff]  ;;  %vm819_vm9 = vcmask 1044484   ;;  %vm821_vm10 = vcmask 1045509  }
  0x20   :  { %2658 = vmatpush3.msra.mxu0 %v96_v11  ;;  %v203_v36 = vld [vmem:[%s3973_s25] sm:$0xff]  ;;  %360 = vmatprep.subr.mxu1 %v318_v59  ;;  %v314_v63 = vld [vmem:[%s3944_s12 + $0x48] sm:$0xff]  ;;  %v312_v1 = vld [vmem:[%s3944_s12 + $0x38] sm:$0xff]  ;;  %vm823_vm11 = vcmask 1046534   ;;  %vm825_vm12 = vcmask 1047559   ;;  %vm953_vm13 = vcmask 64512  }
  0x21   :  { %2659 = vmatprep.subr.mxu0 %v2877_v3  ;;  %v2525_v37 = vld [vmem:[%s3974_s1] ss:$0 sm:$0xff]  ;;  %v2528_v38 = vld [vmem:[%s3974_s1 + $0x1] ss:$0 sm:$0xff]  ;;  %361 = vmatpush1.msra.mxu1 %v317_v60  ;;  %v311_v2 = vld [vmem:[%s3944_s12 + $0x30] sm:$0xff]  ;;  %s2886_s25 = smov 96  }
  0x22   :  { %2660 = vmatpush3.msra.mxu0 %v95_v12  ;;  %362 = vmatprep.subr.mxu1 %v316_v61  ;;  %v313_v0 = vld [vmem:[%s3944_s12 + $0x40] sm:$0xff]  ;;  %v310_v4 = vld [vmem:[%s3944_s12 + $0x28] sm:$0xff]  ;;  %v308_v6 = vld [vmem:[%s3944_s12 + $0x18] sm:$0xff]  ;;  %vm2148_vm14 = vcmask 261120   ;;  %vm2150_vm15 = vcmask 392192   ;;  %s2888_s1 = smov [#allocation2]  }
  0x23   :  { %2661 = vmatprep.subr.mxu0 %v2877_v3  ;;  %363 = vmatpush1.msra.mxu1 %v315_v62  ;;  %v309_v5 = vld [vmem:[%s3944_s12 + $0x20] sm:$0xff]  ;;  %v307_v7 = vld [vmem:[%s3944_s12 + $0x10] sm:$0xff]  ;;  %v306_v8 = vld [vmem:[%s3944_s12 + $0x8] sm:$0xff]  ;;  %s2515_s5 = sshll.u32 %s2888_s1, 4  ;;  %s2516_s5 = int_to_ptr.vmem [resolvable:$true] %s2515_s5 }
  0x24   :  { %2662 = vmatpush3.msra.mxu0 %v94_v13  ;;  %364 = vmatprep.subr.mxu1 %v314_v63  ;;  %v305_v9 = vld [vmem:[%s3944_s12] sm:$0xff]  ;;  %s3975_s12 = sld [smem:[#allocation12_spill]]  ;;  %v303_v57 = vld [vmem:[%s3977_s3 + $0x30] sm:$0xff]  ;;  %v304_v58 = vld [vmem:[%s3977_s3 + $0x38] sm:$0xff]  ;;  %s2854_s26 = scalar_lea.vmem %s2516_s5, 128 }
  0x25   :  { %2663 = vmatprep.subr.mxu0 %v2877_v3  ;;  %365 = vmatpush1.msra.mxu1 %v313_v0  ;;  %p2855_p0 = scmp.ne.s32.totalorder %s2516_s5, %s2854_s26  ;;  %p2859_p1 = scmp.lt.s32.totalorder %s2516_s5, %s2516_s5 }
  0x26   :  { %2664 = vmatpush3.msra.mxu0 %v93_v14  ;;  %366 = vmatprep.subr.mxu1 %v312_v1  ;;  %p2860_p2 = scmp.lt.s32.totalorder %s2854_s26, %s2854_s26 }
  0x27   :  { %2665 = vmatprep.subr.mxu0 %v2877_v3  ;;  %367 = vmatpush1.msra.mxu1 %v311_v2 }
  0x28   :  { %2666 = vmatpush3.msra.mxu0 %v92_v15  ;;  %368 = vmatprep.subr.mxu1 %v310_v4  ;;  %p2861_p3 = por %p2860_p2, %p2859_p1 }
  0x29   :  { %2667 = vmatprep.subr.mxu0 %v2877_v3  ;;  %369 = vmatpush1.msra.mxu1 %v309_v5 }
  0x2a   :  { %2668 = vmatpush3.msra.mxu0 %v91_v16  ;;  %370 = vmatprep.subr.mxu1 %v308_v6  ;;  %p2862_p4 = pnand %p2861_p3, %p2855_p0 }
  0x2b   :  { %2669 = vmatprep.subr.mxu0 %v2877_v3  ;;  %371 = vmatpush1.msra.mxu1 %v307_v7 }
  0x2c   :  { %2670 = vmatpush3.msra.mxu0 %v90_v17  ;;  %372 = vmatprep.subr.mxu1 %v306_v8 }
  0x2d   :  { %2671 = vmatprep.subr.mxu0 %v2877_v3  ;;  %373 = vmatpush1.msra.mxu1 %v305_v9 }
  0x2e   :  { %2672 = vmatpush3.msra.mxu0 %v89_v18 }
  0x2f   :  { %2673 = vmatprep.subr.mxu0 %v2877_v3 }
  0x30   :  { %2674 = vmatpush3.msra.mxu0 %v88_v19 }
  0x31   :  { %2675 = vmatprep.subr.mxu0 %v2877_v3 }
  0x32   :  { %2676 = vmatpush3.msra.mxu0 %v87_v20 }
  0x33   :  { %2696 = vmatprep.subr.mxu0 %v2877_v3 }
  0x35   :  { %256 = vadd.xlane.f32.xlu0 %v255_v22 }
  0x39   :  { %259 = vadd.xlane.f32.xlu0 %v258_v24 }
  0x8d   :  { %v83_v28 = vpop.permute.xlu0 %82 }
  0x8e   :  { %vm84_vm4 = vcmp.eq.s32.totalorder %v83_v28, %v3103_v27 }
  0x8f   :  { %2678 = vmatmul.mubr.msk.f32.vlgmr.msra.gmra.mxu0 %vm84_vm4, %v2879_v29  ;;  %v2533_v29 = vld [vmem:[%s3942_s10] ss:$0 sm:$0xff]  ;;  %s2883_s10 = smov 32  }
  0x90   :  { %2698 = vmatprep.mubr.msk.f32.mxu0 %vm2878_vm1, %v2877_v3 }
  0x91   :  { %v111_v30 = vpop.permute.xlu0 %110 }
  0x92   :  { %v117_v40 = vmul.f32 %v2525_v37, %v111_v30 }
  0x96   :  { %v195_v39 = vpop.permute.xlu1 %194 }
  0x97   :  { %v201_v41 = vmul.f32 %v2528_v38, %v195_v39  ;;  %v297_v39 = vld [vmem:[%s3977_s3] sm:$0xff] }
  0xbe   :  { %v257_v31 = vpop.xlane.xlu0 %256 }
  0xbf   :  { %v261_v32 = vmul.f32 0.015625, %v257_v31 }
  0xc1   :  { %v3108_v33 = vsub.f32 %v251_v21, %v261_v32  ;;  %v2531_v21 = vld [vmem:[%s3975_s12] ss:$0 sm:$0xff] }
  0xc2   :  { %v260_v47 = vpop.xlane.xlu0 %259 }
  0xc3   :  { %v265_v34 = vmul.f32 %v3108_v33, %v3108_v33  ;;  %v262_v48 = vmul.f32 0.015625, %v260_v47 }
  0xc5   :  { %v267_v35 = vsel %vm221_vm2, %v265_v34, 0.0  ;;  %v3123_v50 = vsub.f32 %v252_v23, %v262_v48  ;;  %v2532_v23 = vld [vmem:[%s3976_s6] ss:$0 sm:$0xff] }
  0xc6   :  { %268 = vadd.xlane.f32.xlu0 %v267_v35 }
  0xc7   :  { %v266_v54 = vmul.f32 %v3123_v50, %v3123_v50 }
  0xc9   :  { %v270_v56 = vsel %vm221_vm2, %v266_v54, 0.0  ;;  %v300_v54 = vld [vmem:[%s3977_s3 + $0x18] sm:$0xff] }
  0xdc   :  { %207 = vperm.xlu0 %2822, %v203_v36   ;;  %v2534_v36 = vld [vmem:[%s3943_s11] ss:$0 sm:$0xff] }
 0x14f   :  { %v184_v42 = vpop.f32.mrf.mxu0  ;;  %v269_v10 = vpop.xlane.xlu0 %268 }
 0x150   :  { %v185_v43 = vadd.f32 %v184_v42, %v117_v40  ;;  %v273_v11 = vmul.f32 0.015625, %v269_v10  ;;  %v3207_v40 = vshrl.u32 %v78_v26, 7  ;;  %v321_v42 = vld [vmem:[%s3945_s13] sm:$0x3]  ;;  %s2887_s13 = smov 80  }
 0x151   :  { %v2679_v44 = vpop.f32.mrf.mxu0 }
 0x152   :  { %v202_v45 = vadd.f32 %v201_v41, %v185_v43  ;;  %v275_v12 = vadd.f32 1e-07, %v273_v11  ;;  %v3210_v41 = vsub.s32 0, %v3207_v40  ;;  %v329_v59 = vsub.s32 1, %v3207_v40 }
 0x154   :  { %v222_v46 = vsel %vm221_vm2, %v202_v45, 0.0  ;;  %2824 = vrsqrt.f32 %v275_v12  ;;  %v326_v43 = vrot.slane %v321_v42, %v3210_v41  ;;  %v330_v60 = vrot.slane %v321_v42, %v329_v59 }
 0x155   :  { %223 = vadd.xlane.f32.xlu1 %v222_v46 }
 0x157   :  { %v3187_v31 = vpop.permute.xlu0 %207 }
 0x161   :  { %v2825_v19 = vpop.eup %2824 }
 0x162   :  { %v279_v25 = vmul.f32 %v2825_v19, %v3108_v33 }
 0x164   :  { %v287_v34 = vmul.f32 %v2533_v29, %v279_v25  ;;  %v2881_v25 = vmov 1966171168  }
 0x166   :  { %v295_v33 = vadd.f32 %v2534_v36, %v287_v34 }
 0x1de   :  { %v224_v49 = vpop.xlane.xlu1 %223 }
 0x1df   :  { %v226_v51 = vmul.f32 0.015625, %v224_v49 }
 0x1e1   :  { %v227_v52 = vsub.f32 %v202_v45, %v226_v51 }
 0x1e3   :  { %v228_v53 = vmul.f32 %v227_v52, %v227_v52 }
 0x1e5   :  { %v229_v55 = vsel %vm221_vm2, %v228_v53, 0.0  ;;  %v299_v53 = vld [vmem:[%s3977_s3 + $0x10] sm:$0xff] }
 0x1e6   :  { %230 = vadd.xlane.f32.xlu1 %v229_v55  ;;  %v301_v55 = vld [vmem:[%s3977_s3 + $0x20] sm:$0xff] }
 0x1ea   :  { %271 = vadd.xlane.f32.xlu1 %v270_v56  ;;  %v302_v56 = vld [vmem:[%s3977_s3 + $0x28] sm:$0xff] }
 0x26f   :  { %v231_v13 = vpop.xlane.xlu1 %230 }
 0x270   :  { %v232_v14 = vmul.f32 0.015625, %v231_v13 }
 0x272   :  { %v233_v15 = vadd.f32 1e-07, %v232_v14 }
 0x273   :  { %v272_v16 = vpop.xlane.xlu1 %271 }
 0x274   :  { %2826 = vrsqrt.f32 %v233_v15  ;;  %v274_v17 = vmul.f32 0.015625, %v272_v16 }
 0x276   :  { %v276_v18 = vadd.f32 1e-07, %v274_v17 }
 0x278   :  { %2828 = vrsqrt.f32 %v276_v18 }
 0x281   :  { %v2827_v20 = vpop.eup %2826 }
 0x282   :  { %v235_v22 = vmul.f32 %v2827_v20, %v227_v52  ;;  %v298_v52 = vld [vmem:[%s3977_s3 + $0x8] sm:$0xff]  ;;  %s2885_s3 = smov 48  }
 0x284   :  { %v242_v24 = vmul.f32 %v2531_v21, %v235_v22 }
 0x285   :  { %v2829_v28 = vpop.eup %2828 }
 0x286   :  { %v249_v30 = vadd.f32 %v2532_v23, %v242_v24  ;;  %v280_v35 = vmul.f32 %v2829_v28, %v3123_v50  ;;  %v556_v28 = vunpack.c.l.s4 %v2881_v25 }
 0x288   :  { %v3190_v32 = vmul.f32 %v249_v30, %v3187_v31  ;;  %v288_v37 = vmul.f32 %v2533_v29, %v280_v35  ;;  %v557_v30 = vunpack.c.0.s8 %v556_v28 }
 0x28a   :  { %2535 = vmatmul.mubr.msk.f32.vlgmr.msra.gmra.mxu1 %vm221_vm2, %v3190_v32  ;;  %v296_v38 = vadd.f32 %v2534_v36, %v288_v37  ;;  %v560_v34 = vsub.s32 %v557_v30, %v3207_v40 }
 0x28b   :  { %412 = vmatprep.mubr.f32.mxu1 %v2877_v3 }
 0x28e   :  { %2536 = vmatmul.mubr.msk.f32.gmra.mxu1 %vm221_vm2, %v295_v33 }
 0x28f   :  { %417 = vmatprep.mubr.f32.mxu1 %v2877_v3 }
 0x292   :  { %2537 = vmatmul.mubr.msk.f32.gmra.mxu1 %vm221_vm2, %v296_v38 }
 0x293   :  { %2684 = vmatprep.mubr.msk.f32.mxu1 %vm423_vm5, %v297_v39 }
 0x34a   :  { %v408_v44 = vpop.f32.mrf.mxu1 }
 0x34b   :  { %v3216_v45 = vadd.f32 %v408_v44, %v326_v43 }
 0x34c   :  { %v410_v46 = vpop.f32.mrf.mxu1 }
 0x34d   :  { %771 = vrot.lane.b32.xlu1 %v3216_v45, %s2880_s0  ;;  %v3254_v62 = vadd.f32 %v410_v46, %v330_v60  ;;  %v561_v35 = vrot.slane %v3216_v45, %v560_v34  ;;  %v554_v38 = vcombine.high %v3216_v45, %v3216_v45 }
 0x34e   :  { %v414_v47 = vpop.f32.mrf.mxu1 }
 0x34f   :  { %v415_v51 = vadd.f32 %v414_v47, %v326_v43  ;;  %v569_v36 = vcombine.high %v561_v35, %v561_v35  ;;  %v577_v37 = vrot.slane %v561_v35, %v560_v34 }
 0x350   :  { %v416_v26 = vpop.f32.mrf.mxu1 }
 0x351   :  { %v591_v33 = vrot.slane %v569_v36, %v560_v34  ;;  %v599_v42 = vcombine.high %v577_v37, %v577_v37 }
 0x352   :  { %v419_v48 = vpop.f32.mrf.mxu1 }
 0x353   :  { %v420_v49 = vadd.f32 %v419_v48, %v326_v43  ;;  %v610_v39 = vrot.slane %v591_v33, %v3210_v41  ;;  %v568_v43 = vrot.slane %v554_v38, %v560_v34  ;;  %v614_v46 = vrot.slane %v599_v42, %v3210_v41 }
 0x354   :  { %v421_v50 = vpop.f32.mrf.mxu1 }
 0x355   :  { %2680 = vmatprep.subr.mxu1 %v420_v49  ;;  %v570_v47 = vcombine.high %v568_v43, %v568_v43  ;;  %v584_v26 = vrot.slane %v568_v43, %v560_v34  ;;  %v606_v50 = vrot.slane %v577_v37, %v3210_v41 }
 0x356   :  { %2681 = vmatpush3.msra.mxu1 %v420_v49 }
 0x357   :  { %2682 = vmatprep.subr.mxu1 %v415_v51  ;;  %v600_v59 = vcombine.high %v584_v26, %v584_v26 }
 0x358   :  { %2683 = vmatpush3.msra.mxu1 %v415_v51  ;;  %v601_v51 = vcombine.high %v591_v33, %v591_v33 }
 0x359   :  { %2685 = vmatmul.mubr.msk.f32.vlgmr.msra.gmra.mxu1 %vm423_vm5, %v298_v52  ;;  %2711 = vmatprep.subr.mxu1 %v2877_v3  ;;  %v598_v52 = vrot.slane %v570_v47, %v560_v34 }
 0x35a   :  { %2687 = vmatprep.mubr.msk.f32.mxu1 %vm423_vm5, %v299_v53  ;;  %v622_v53 = vrot.slane %v584_v26, %v3210_v41 }
 0x35d   :  { %2688 = vmatmul.mubr.msk.f32.gmra.mxu1 %vm423_vm5, %v300_v54 }
 0x35e   :  { %2690 = vmatprep.mubr.msk.f32.mxu1 %vm423_vm5, %v301_v55 }
 0x361   :  { %2691 = vmatmul.mubr.msk.f32.gmra.mxu1 %vm423_vm5, %v302_v56 }
 0x362   :  { %2693 = vmatprep.mubr.msk.f32.mxu1 %vm423_vm5, %v303_v57  ;;  %v618_v57 = vrot.slane %v601_v51, %v3210_v41 }
 0x365   :  { %2694 = vmatmul.mubr.msk.f32.gmra.mxu1 %vm423_vm5, %v304_v58  ;;  %v626_v58 = vrot.slane %v598_v52, %v3210_v41 }
 0x366   :  { %2713 = vmatprep.mubr.msk.f32.mxu1 %vm2878_vm1, %v2877_v3 }
 0x3bf   :  { %v772_v61 = vpop.permute.xlu1 %771 }
 0x3c0   :  { %2697 = vmatpush3.xpose.msk.msra.mxu0 %vm423_vm5, %v772_v61 }
 0x3c1   :  { %2701 = vmatprep.subr.mxu0 %v2877_v3 }
 0x3c3   :  { %2699 = vmatmul.mubr.msk.f32.vlgmr.msra.gmra.mxu0 %vm423_vm5, %v3216_v45 }
 0x3c4   :  { %2702 = vmatpush3.msra.mxu0 %v3254_v62  ;;  %2703 = vmatprep.mubr.msk.f32.mxu0 %vm2878_vm1, %v2877_v3 }
 0x3c5   :  { %2706 = vmatprep.subr.mxu0 %v2877_v3 }
 0x419   :  { %v2686_v63 = vpop.f32.mrf.mxu1 }
 0x41a   :  { %653 = vrot.lane.b32.xlu0 %v2686_v63, %s2880_s0 }
 0x41b   :  { %v514_v0 = vpop.f32.mrf.mxu1 }
 0x41c   :  { %651 = vrot.lane.b32.xlu1 %v514_v0, %s2880_s0 }
 0x41d   :  { %v2689_v1 = vpop.f32.mrf.mxu1 }
 0x41e   :  { %657 = vrot.lane.b32.xlu0 %v2689_v1, %s2880_s0  ;;  %v630_v1 = vrot.slane %v600_v59, %v3210_v41 }
 0x41f   :  { %v524_v2 = vpop.f32.mrf.mxu1 }
 0x420   :  { %655 = vrot.lane.b32.xlu1 %v524_v2, %s2880_s0 }
 0x421   :  { %v2692_v4 = vpop.f32.mrf.mxu1 }
 0x422   :  { %661 = vrot.lane.b32.xlu0 %v2692_v4, %s2880_s0 }
 0x423   :  { %v534_v5 = vpop.f32.mrf.mxu1 }
 0x424   :  { %659 = vrot.lane.b32.xlu1 %v534_v5, %s2880_s0 }
 0x425   :  { %v2695_v6 = vpop.f32.mrf.mxu1 }
 0x426   :  { %665 = vrot.lane.b32.xlu0 %v2695_v6, %s2880_s0 }
 0x427   :  { %v544_v7 = vpop.f32.mrf.mxu1 }
 0x428   :  { %663 = vrot.lane.b32.xlu1 %v544_v7, %s2880_s0  ;;  %v602_v7 = vcombine.high %v598_v52, %v598_v52 }
 0x483   :  { %v3270_v8 = vpop.f32.mrf.mxu0 }
 0x485   :  { %v2700_v9 = vpop.f32.mrf.mxu0 }
 0x48c   :  { %v654_v10 = vpop.permute.xlu0 %653 }
 0x48d   :  { %v3273_v11 = vmul.f32 %v654_v10, %v3216_v45  ;;  %v3317_v44 = vmul.f32 %v654_v10, %v610_v39  ;;  %v634_v10 = vrot.slane %v602_v7, %v3210_v41 }
 0x48e   :  { %v652_v12 = vpop.permute.xlu1 %651 }
 0x48f   :  { %v3276_v13 = vmul.f32 %v652_v12, %v3216_v45  ;;  %725 = vrot.lane.b32.xlu0 %v3273_v11, %s2880_s0  ;;  %v686_v49 = vsel %vm423_vm5, %v3317_v44, 0.0  ;;  %v3326_v54 = vmul.f32 %v652_v12, %v606_v50  ;;  %v3378_v50 = vsub.s32 %v3103_v27, %v3207_v40 }
 0x490   :  { %v658_v14 = vpop.permute.xlu0 %657 }
 0x491   :  { %v3281_v15 = vmul.f32 %v658_v14, %v3216_v45  ;;  %723 = vrot.lane.b32.xlu1 %v3276_v13, %s2880_s0  ;;  %v3334_v60 = vmul.f32 %v658_v14, %v618_v57  ;;  %v683_v61 = vsel %vm423_vm5, %v3326_v54, 0.0 }
 0x492   :  { %v656_v16 = vpop.permute.xlu1 %655 }
 0x493   :  { %v3286_v17 = vmul.f32 %v656_v16, %v3216_v45  ;;  %729 = vrot.lane.b32.xlu0 %v3281_v15, %s2880_s0  ;;  %v3320_v48 = vmul.f32 %v656_v16, %v614_v46  ;;  %v692_v2 = vsel %vm423_vm5, %v3334_v60, 0.0 }
 0x494   :  { %v662_v18 = vpop.permute.xlu0 %661 }
 0x495   :  { %v3291_v19 = vmul.f32 %v662_v18, %v3216_v45  ;;  %727 = vrot.lane.b32.xlu1 %v3286_v17, %s2880_s0  ;;  %v689_v56 = vsel %vm423_vm5, %v3320_v48, 0.0  ;;  %v3338_v63 = vmul.f32 %v662_v18, %v626_v58 }
 0x496   :  { %v660_v20 = vpop.permute.xlu1 %659 }
 0x497   :  { %v3296_v21 = vmul.f32 %v660_v20, %v3216_v45  ;;  %733 = vrot.lane.b32.xlu0 %v3291_v19, %s2880_s0  ;;  %v3328_v55 = vmul.f32 %v660_v20, %v622_v53  ;;  %v698_v5 = vsel %vm423_vm5, %v3338_v63, 0.0 }
 0x498   :  { %v666_v22 = vpop.permute.xlu0 %665 }
 0x499   :  { %v3301_v23 = vmul.f32 %v666_v22, %v3216_v45  ;;  %731 = vrot.lane.b32.xlu1 %v3296_v21, %s2880_s0  ;;  %v695_v0 = vsel %vm423_vm5, %v3328_v55, 0.0  ;;  %v3353_v16 = vmul.f32 %v666_v22, %v634_v10 }
 0x49a   :  { %v664_v24 = vpop.permute.xlu1 %663 }
 0x49b   :  { %v3306_v29 = vmul.f32 %v664_v24, %v3216_v45  ;;  %737 = vrot.lane.b32.xlu0 %v3301_v23, %s2880_s0  ;;  %v3345_v4 = vmul.f32 %v664_v24, %v630_v1  ;;  %v704_v28 = vsel %vm423_vm5, %v3353_v16, 0.0 }
 0x49d   :  { %735 = vrot.lane.b32.xlu1 %v3306_v29, %s2880_s0  ;;  %v701_v6 = vsel %vm423_vm5, %v3345_v4, 0.0  ;;  %s3978_s0 = sld [smem:[#allocation8_spill]] }
 0x4ba   :  { %687 = vadd.xlane.f32.xlu0 %v686_v49 }
 0x4be   :  { %690 = vadd.xlane.f32.xlu0 %v689_v56 }
 0x4c1   :  { %684 = vadd.xlane.f32.xlu1 %v683_v61 }
 0x4c2   :  { %696 = vadd.xlane.f32.xlu0 %v695_v0 }
 0x4c5   :  { %693 = vadd.xlane.f32.xlu1 %v692_v2 }
 0x4c6   :  { %699 = vadd.xlane.f32.xlu0 %v698_v5 }
 0x4ca   :  { %702 = vadd.xlane.f32.xlu0 %v701_v6 }
 0x501   :  { %v726_v9 = vpop.permute.xlu0 %725 }
 0x502   :  { %v750_v12 = vsel %vm423_vm5, %v726_v9, 0.0 }
 0x503   :  { %751 = vadd.xlane.f32.xlu1 %v750_v12  ;;  %v724_v14 = vpop.permute.xlu1 %723 }
 0x504   :  { %v747_v18 = vsel %vm423_vm5, %v724_v14, 0.0 }
 0x505   :  { %v730_v20 = vpop.permute.xlu0 %729  ;;  %748 = vadd.xlane.f32.xlu0 %v747_v18 }
 0x506   :  { %v756_v24 = vsel %vm423_vm5, %v730_v20, 0.0  ;;  %v2529_v20 = vld [vmem:[%s3978_s0] ss:$0 sm:$0xff] }
 0x507   :  { %757 = vadd.xlane.f32.xlu1 %v756_v24  ;;  %v728_v25 = vpop.permute.xlu1 %727 }
 0x508   :  { %v753_v41 = vsel %vm423_vm5, %v728_v25, 0.0 }
 0x509   :  { %705 = vadd.xlane.f32.xlu0 %v704_v28  ;;  %v734_v30 = vpop.permute.xlu0 %733 }
 0x50a   :  { %v762_v22 = vsel %vm423_vm5, %v734_v30, 0.0 }
 0x50b   :  { %754 = vadd.xlane.f32.xlu1 %v753_v41  ;;  %v732_v34 = vpop.permute.xlu1 %731 }
 0x50c   :  { %v759_v33 = vsel %vm423_vm5, %v732_v34, 0.0 }
 0x50d   :  { %v738_v37 = vpop.permute.xlu0 %737 }
 0x50e   :  { %v768_v38 = vsel %vm423_vm5, %v738_v37, 0.0 }
 0x50f   :  { %763 = vadd.xlane.f32.xlu1 %v762_v22  ;;  %v736_v35 = vpop.permute.xlu1 %735 }
 0x510   :  { %v765_v36 = vsel %vm423_vm5, %v736_v35, 0.0  ;;  %v3404_v35 = vmul.f32 %v2529_v20, %v3187_v31 }
 0x511   :  { %766 = vadd.xlane.f32.xlu0 %v765_v36 }
 0x513   :  { %760 = vadd.xlane.f32.xlu1 %v759_v33 }
 0x517   :  { %769 = vadd.xlane.f32.xlu1 %v768_v38 }
 0x528   :  { %1144 = vrot.lane.b32.xlu1 %v3216_v45, %s2882_s30 }
 0x52c   :  { %1509 = vrot.lane.b32.xlu1 %v3216_v45, %s2883_s10 }
 0x530   :  { %1871 = vrot.lane.b32.xlu1 %v3216_v45, %s2884_s19 }
 0x534   :  { %1048 = vrot.lane.b32.xlu1 %v3326_v54, %s2882_s30 }
 0x538   :  { %1052 = vrot.lane.b32.xlu1 %v3320_v48, %s2882_s30 }
 0x53c   :  { %1096 = vrot.lane.b32.xlu1 %v3276_v13, %s2885_s3 }
 0x543   :  { %v688_v39 = vpop.xlane.xlu0 %687 }
 0x544   :  { %v788_v56 = vrot.slane %v688_v39, %v3378_v50 }
 0x547   :  { %v691_v42 = vpop.xlane.xlu0 %690 }
 0x548   :  { %v792_v61 = vrot.slane %v691_v42, %v3378_v50 }
 0x54a   :  { %v685_v43 = vpop.xlane.xlu1 %684 }
 0x54b   :  { %v697_v46 = vpop.xlane.xlu0 %696  ;;  %v784_v52 = vrot.slane %v685_v43, %v3378_v50 }
 0x54c   :  { %v800_v5 = vrot.slane %v697_v46, %v3378_v50 }
 0x54d   :  { %v814_v58 = vsel %vm813_vm6, %v788_v56, %v784_v52 }
 0x54e   :  { %v694_v47 = vpop.xlane.xlu1 %693  ;;  %v816_v27 = vsel %vm815_vm7, %v792_v61, %v814_v58 }
 0x54f   :  { %v700_v26 = vpop.xlane.xlu0 %699  ;;  %v796_v59 = vrot.slane %v694_v47, %v3378_v50 }
 0x550   :  { %v804_v10 = vrot.slane %v700_v26, %v3378_v50  ;;  %v2530_v26 = vadd.f32 -1.0, %v3404_v35 }
 0x551   :  { %v818_v1 = vsel %vm817_vm8, %v796_v59, %v816_v27 }
 0x552   :  { %v820_v12 = vsel %vm819_vm9, %v800_v5, %v818_v1 }
 0x553   :  { %v703_v51 = vpop.xlane.xlu0 %702  ;;  %v822_v34 = vsel %vm821_vm10, %v804_v10, %v820_v12 }
 0x554   :  { %v808_v14 = vrot.slane %v703_v51, %v3378_v50 }
 0x556   :  { %v824_v36 = vsel %vm823_vm11, %v808_v14, %v822_v34 }
 0x58c   :  { %v752_v49 = vpop.xlane.xlu1 %751 }
 0x58d   :  { %v917_v6 = vrot.slane %v752_v49, %v3378_v50 }
 0x58e   :  { %v749_v57 = vpop.xlane.xlu0 %748 }
 0x58f   :  { %v913_v40 = vrot.slane %v749_v57, %v3378_v50 }
 0x590   :  { %v758_v53 = vpop.xlane.xlu1 %757 }
 0x591   :  { %v942_v18 = vsel %vm813_vm6, %v917_v6, %v913_v40  ;;  %v925_v28 = vrot.slane %v758_v53, %v3378_v50  ;;  %v3418_v53 = vmul.f32 1e+30, %v2530_v26 }
 0x592   :  { %v706_v7 = vpop.xlane.xlu0 %705 }
 0x593   :  { %v812_v24 = vrot.slane %v706_v7, %v3378_v50 }
 0x594   :  { %v755_v0 = vpop.xlane.xlu1 %754 }
 0x595   :  { %v921_v2 = vrot.slane %v755_v0, %v3378_v50  ;;  %v826_v38 = vsel %vm825_vm12, %v812_v24, %v824_v36 }
 0x596   :  { %v899_v49 = vadd.f32 %v3270_v8, %v826_v38 }
 0x597   :  { %v943_v25 = vsel %vm815_vm7, %v921_v2, %v942_v18 }
 0x598   :  { %v764_v9 = vpop.xlane.xlu1 %763  ;;  %v944_v37 = vsel %vm817_vm8, %v925_v28, %v943_v25 }
 0x599   :  { %v933_v33 = vrot.slane %v764_v9, %v3378_v50 }
 0x59a   :  { %v767_v41 = vpop.xlane.xlu0 %766 }
 0x59b   :  { %v937_v39 = vrot.slane %v767_v41, %v3378_v50 }
 0x59c   :  { %v761_v30 = vpop.xlane.xlu1 %760 }
 0x59d   :  { %v929_v22 = vrot.slane %v761_v30, %v3378_v50 }
 0x59f   :  { %v945_v42 = vsel %vm819_vm9, %v929_v22, %v944_v37 }
 0x5a0   :  { %v946_v43 = vsel %vm821_vm10, %v933_v33, %v945_v42  ;;  %v770_v46 = vpop.xlane.xlu1 %769 }
 0x5a1   :  { %v941_v47 = vrot.slane %v770_v46, %v3378_v50  ;;  %v947_v31 = vsel %vm823_vm11, %v937_v39, %v946_v43 }
 0x5a3   :  { %v948_v51 = vsel %vm825_vm12, %v941_v47, %v947_v31 }
 0x5a4   :  { %v950_v52 = vadd.f32 %v948_v51, %v899_v49 }
 0x5a6   :  { %v951_v56 = vmul.f32 0.14433756, %v950_v52 }
 0x5a8   :  { %v952_v57 = vadd.f32 %v951_v56, %v3418_v53 }
 0x5aa   :  { %v954_v58 = vsel %vm953_vm13, %v952_v57, -inf }
 0x5ab   :  { %955 = vmax.xlane.f32.xlu0 %v954_v58 }
 0x5c1   :  { %1146 = vrot.lane.b32.xlu0 %v3216_v45, %s2885_s3 }
 0x5c5   :  { %1507 = vrot.lane.b32.xlu0 %v3216_v45, %s2886_s25 }
 0x5c9   :  { %1869 = vrot.lane.b32.xlu0 %v3216_v45, %s2887_s13  ;;  %v3476_v45 = vpop.permute.xlu1 %1144 }
 0x5cd   :  { %1050 = vrot.lane.b32.xlu0 %v3317_v44, %s2882_s30  ;;  %v3478_v8 = vpop.permute.xlu1 %1509 }
 0x5d1   :  { %1054 = vrot.lane.b32.xlu0 %v3334_v60, %s2882_s30 }
 0x5d5   :  { %1098 = vrot.lane.b32.xlu0 %v3273_v11, %s2885_s3 }
 0x5d9   :  { %1100 = vrot.lane.b32.xlu0 %v3286_v17, %s2885_s3 }
 0x5dd   :  { %1102 = vrot.lane.b32.xlu0 %v3281_v15, %s2885_s3 }
 0x5e1   :  { %1413 = vrot.lane.b32.xlu0 %v3317_v44, %s2886_s25 }
 0x5e5   :  { %1104 = vrot.lane.b32.xlu0 %v3296_v21, %s2885_s3 }
 0x5e9   :  { %1062 = vrot.lane.b32.xlu0 %v3353_v16, %s2882_s30 }
 0x5ed   :  { %1417 = vrot.lane.b32.xlu0 %v3334_v60, %s2886_s25 }
 0x5f1   :  { %1461 = vrot.lane.b32.xlu0 %v3273_v11, %s2883_s10 }
 0x5f5   :  { %1419 = vrot.lane.b32.xlu0 %v3328_v55, %s2886_s25 }
 0x5f9   :  { %1110 = vrot.lane.b32.xlu0 %v3301_v23, %s2885_s3 }
 0x5fd   :  { %1465 = vrot.lane.b32.xlu0 %v3281_v15, %s2883_s10 }
 0x601   :  { %1775 = vrot.lane.b32.xlu0 %v3317_v44, %s2887_s13 }
 0x605   :  { %1467 = vrot.lane.b32.xlu0 %v3296_v21, %s2883_s10 }
 0x609   :  { %1425 = vrot.lane.b32.xlu0 %v3353_v16, %s2886_s25 }
 0x60d   :  { %1779 = vrot.lane.b32.xlu0 %v3334_v60, %s2887_s13 }
 0x611   :  { %1823 = vrot.lane.b32.xlu0 %v3273_v11, %s2884_s19 }
 0x615   :  { %1781 = vrot.lane.b32.xlu0 %v3328_v55, %s2887_s13 }
 0x619   :  { %1473 = vrot.lane.b32.xlu0 %v3301_v23, %s2883_s10 }
 0x61d   :  { %1827 = vrot.lane.b32.xlu0 %v3281_v15, %s2884_s19  ;;  %v3482_v15 = vpop.permute.xlu1 %1871 }
 0x621   :  { %1829 = vrot.lane.b32.xlu0 %v3296_v21, %s2884_s19  ;;  %v1049_v21 = vpop.permute.xlu1 %1048 }
 0x622   :  { %v1072_v14 = vsel %vm423_vm5, %v1049_v21, 0.0 }
 0x625   :  { %1831 = vrot.lane.b32.xlu0 %v3291_v19, %s2884_s19 }
 0x629   :  { %1835 = vrot.lane.b32.xlu0 %v3301_v23, %s2884_s19  ;;  %v1053_v23 = vpop.permute.xlu1 %1052 }
 0x62a   :  { %v1078_v6 = vsel %vm423_vm5, %v1053_v23, 0.0 }
 0x62d   :  { %v1097_v7 = vpop.permute.xlu1 %1096 }
 0x62e   :  { %v1120_v9 = vsel %vm423_vm5, %v1097_v7, 0.0 }
 0x634   :  { %v956_v11 = vpop.xlane.xlu0 %955 }
 0x635   :  { %v957_v44 = vsub.f32 %v952_v57, %v956_v11 }
 0x637   :  { %v958_v60 = vmul.f32 1.442695, %v957_v44 }
 0x638   :  { %v3480_v59 = vpop.permute.xlu0 %1146 }
 0x639   :  { %2830 = vpow2.f32 %v958_v60 }
 0x63c   :  { %v3484_v61 = vpop.permute.xlu0 %1507 }
 0x640   :  { %v3486_v0 = vpop.permute.xlu0 %1869 }
 0x644   :  { %v1051_v27 = vpop.permute.xlu0 %1050 }
 0x645   :  { %v1075_v1 = vsel %vm423_vm5, %v1051_v27, 0.0 }
 0x646   :  { %v2831_v40 = vpop.eup %2830 }
 0x647   :  { %v3490_v2 = vmul.f32 %v2831_v40, %v3404_v35 }
 0x648   :  { %1076 = vadd.xlane.f32.xlu0 %v1075_v1 }
 0x649   :  { %v961_v5 = vsel %vm953_vm13, %v3490_v2, 0.0 }
 0x64a   :  { %962 = vadd.xlane.f32.xlu1 %v961_v5 }
 0x64c   :  { %1079 = vadd.xlane.f32.xlu0 %v1078_v6 }
 0x650   :  { %1121 = vadd.xlane.f32.xlu0 %v1120_v9 }
 0x65b   :  { %1056 = vrot.lane.b32.xlu1 %v3328_v55, %s2882_s30 }
 0x65f   :  { %1058 = vrot.lane.b32.xlu1 %v3338_v63, %s2882_s30 }
 0x663   :  { %1411 = vrot.lane.b32.xlu1 %v3326_v54, %s2886_s25 }
 0x667   :  { %1060 = vrot.lane.b32.xlu1 %v3345_v4, %s2882_s30 }
 0x66b   :  { %1415 = vrot.lane.b32.xlu1 %v3320_v48, %s2886_s25 }
 0x66f   :  { %1106 = vrot.lane.b32.xlu1 %v3291_v19, %s2885_s3 }
 0x673   :  { %1459 = vrot.lane.b32.xlu1 %v3276_v13, %s2883_s10 }
 0x677   :  { %1108 = vrot.lane.b32.xlu1 %v3306_v29, %s2885_s3 }
 0x67b   :  { %1463 = vrot.lane.b32.xlu1 %v3286_v17, %s2883_s10 }
 0x67f   :  { %1421 = vrot.lane.b32.xlu1 %v3338_v63, %s2886_s25 }
 0x683   :  { %1773 = vrot.lane.b32.xlu1 %v3326_v54, %s2887_s13  ;;  %v1055_v54 = vpop.permute.xlu0 %1054 }
 0x687   :  { %1423 = vrot.lane.b32.xlu1 %v3345_v4, %s2886_s25 }
 0x68b   :  { %1777 = vrot.lane.b32.xlu1 %v3320_v48, %s2887_s13 }
 0x68f   :  { %1469 = vrot.lane.b32.xlu1 %v3291_v19, %s2883_s10  ;;  %v1099_v19 = vpop.permute.xlu0 %1098 }
 0x693   :  { %1821 = vrot.lane.b32.xlu1 %v3276_v13, %s2884_s19  ;;  %v1101_v13 = vpop.permute.xlu0 %1100 }
 0x694   :  { %v1126_v28 = vsel %vm423_vm5, %v1101_v13, 0.0 }
 0x697   :  { %1471 = vrot.lane.b32.xlu1 %v3306_v29, %s2883_s10  ;;  %v1103_v48 = vpop.permute.xlu0 %1102 }
 0x698   :  { %v1129_v34 = vsel %vm423_vm5, %v1103_v48, 0.0 }
 0x69b   :  { %1825 = vrot.lane.b32.xlu1 %v3286_v17, %s2884_s19  ;;  %v1414_v55 = vpop.permute.xlu0 %1413 }
 0x69c   :  { %v1438_v37 = vsel %vm423_vm5, %v1414_v55, 0.0 }
 0x69f   :  { %1783 = vrot.lane.b32.xlu1 %v3338_v63, %s2887_s13  ;;  %v1105_v10 = vpop.permute.xlu0 %1104  ;;  %v1081_v63 = vsel %vm423_vm5, %v1055_v54, 0.0 }
 0x6a0   :  { %v1132_v47 = vsel %vm423_vm5, %v1105_v10, 0.0 }
 0x6a3   :  { %1785 = vrot.lane.b32.xlu1 %v3345_v4, %s2887_s13  ;;  %v1063_v12 = vpop.permute.xlu0 %1062 }
 0x6a4   :  { %v1093_v49 = vsel %vm423_vm5, %v1063_v12, 0.0 }
 0x6a7   :  { %1787 = vrot.lane.b32.xlu1 %v3353_v16, %s2887_s13  ;;  %v1418_v17 = vpop.permute.xlu0 %1417  ;;  %v1123_v16 = vsel %vm423_vm5, %v1099_v19, 0.0 }
 0x6a8   :  { %v1444_v57 = vsel %vm423_vm5, %v1418_v17, 0.0 }
 0x6ab   :  { %1833 = vrot.lane.b32.xlu1 %v3306_v29, %s2884_s19  ;;  %v1462_v18 = vpop.permute.xlu0 %1461 }
 0x6ac   :  { %v1486_v11 = vsel %vm423_vm5, %v1462_v18, 0.0 }
 0x6af   :  { %v1420_v25 = vpop.permute.xlu0 %1419 }
 0x6b3   :  { %v1111_v22 = vpop.permute.xlu0 %1110 }
 0x6b4   :  { %v1141_v27 = vsel %vm423_vm5, %v1111_v22, 0.0 }
 0x6b7   :  { %v1466_v46 = vpop.permute.xlu0 %1465 }
 0x6b8   :  { %v1492_v1 = vsel %vm423_vm5, %v1466_v46, 0.0 }
 0x6bb   :  { %v1776_v51 = vpop.permute.xlu0 %1775 }
 0x6bc   :  { %v1800_v6 = vsel %vm423_vm5, %v1776_v51, 0.0 }
 0x6cf   :  { %1073 = vadd.xlane.f32.xlu1 %v1072_v14 }
 0x6d3   :  { %v963_v4 = vpop.xlane.xlu1 %962  ;;  %1082 = vadd.xlane.f32.xlu1 %v1081_v63 }
 0x6d4   :  { %v964_v20 = vmax.f32 %v963_v4, 1e-30 }
 0x6d6   :  { %2832 = vrcp.f32 %v964_v20 }
 0x6d7   :  { %v1057_v24 = vpop.permute.xlu1 %1056  ;;  %1124 = vadd.xlane.f32.xlu1 %v1123_v16 }
 0x6d8   :  { %v1084_v29 = vsel %vm423_vm5, %v1057_v24, 0.0 }
 0x6d9   :  { %1085 = vadd.xlane.f32.xlu0 %v1084_v29 }
 0x6db   :  { %v1059_v41 = vpop.permute.xlu1 %1058  ;;  %1127 = vadd.xlane.f32.xlu1 %v1126_v28 }
 0x6dc   :  { %v1087_v30 = vsel %vm423_vm5, %v1059_v41, 0.0 }
 0x6dd   :  { %1088 = vadd.xlane.f32.xlu0 %v1087_v30 }
 0x6df   :  { %v1412_v36 = vpop.permute.xlu1 %1411  ;;  %1130 = vadd.xlane.f32.xlu1 %v1129_v34 }
 0x6e0   :  { %v1435_v33 = vsel %vm423_vm5, %v1412_v36, 0.0 }
 0x6e1   :  { %1436 = vadd.xlane.f32.xlu0 %v1435_v33 }
 0x6e3   :  { %v2833_v38 = vpop.eup %2832  ;;  %v1061_v39 = vpop.permute.xlu1 %1060  ;;  %1439 = vadd.xlane.f32.xlu1 %v1438_v37 }
 0x6e4   :  { %v1090_v42 = vsel %vm423_vm5, %v1061_v39, 0.0  ;;  %v966_v43 = vmul.f32 %v2833_v38, %v3490_v2 }
 0x6e5   :  { %1091 = vadd.xlane.f32.xlu0 %v1090_v42 }
 0x6e6   :  { %2704 = vmatmul.mubr.msk.f32.vlgmr.msra.gmra.mxu0 %vm953_vm13, %v966_v43 }
 0x6e7   :  { %2707 = vmatpush3.xpose.msk.msra.mxu0 %vm423_vm5, %v3480_v59  ;;  %v1416_v31 = vpop.permute.xlu1 %1415  ;;  %1133 = vadd.xlane.f32.xlu1 %v1132_v47  ;;  %v1447_v59 = vsel %vm423_vm5, %v1420_v25, 0.0 }
 0x6e8   :  { %v1441_v26 = vsel %vm423_vm5, %v1416_v31, 0.0  ;;  %2708 = vmatprep.mubr.msk.f32.mxu0 %vm2878_vm1, %v2877_v3  ;;  %2716 = vmatprep.subr.mxu0 %v2877_v3 }
 0x6e9   :  { %1442 = vadd.xlane.f32.xlu0 %v1441_v26 }
 0x6ea   :  { %2709 = vmatmul.mubr.msk.f32.vlgmr.msra.gmra.mxu0 %vm423_vm5, %v3476_v45 }
 0x6eb   :  { %2717 = vmatpush3.xpose.msk.msra.mxu0 %vm423_vm5, %v3478_v8  ;;  %v1107_v52 = vpop.permute.xlu1 %1106  ;;  %1094 = vadd.xlane.f32.xlu1 %v1093_v49  ;;  %v1468_v8 = vpop.permute.xlu0 %1467 }
 0x6ec   :  { %v1135_v56 = vsel %vm423_vm5, %v1107_v52, 0.0  ;;  %2718 = vmatprep.mubr.msk.f32.mxu0 %vm2878_vm1, %v2877_v3  ;;  %2726 = vmatprep.subr.mxu0 %v2877_v3  ;;  %v1495_v19 = vsel %vm423_vm5, %v1468_v8, 0.0 }
 0x6ed   :  { %1136 = vadd.xlane.f32.xlu0 %v1135_v56 }
 0x6ee   :  { %2719 = vmatmul.mubr.msk.f32.vlgmr.msra.gmra.mxu0 %vm423_vm5, %v3484_v61 }
 0x6ef   :  { %2727 = vmatpush3.xpose.msk.msra.mxu0 %vm423_vm5, %v3482_v15  ;;  %v1460_v58 = vpop.permute.xlu1 %1459  ;;  %1445 = vadd.xlane.f32.xlu1 %v1444_v57  ;;  %v1426_v15 = vpop.permute.xlu0 %1425 }
 0x6f0   :  { %v1483_v45 = vsel %vm423_vm5, %v1460_v58, 0.0  ;;  %2728 = vmatprep.mubr.msk.f32.mxu0 %vm2878_vm1, %v2877_v3  ;;  %2774 = vmatprep.subr.mxu0 %v2877_v3  ;;  %v1456_v10 = vsel %vm423_vm5, %v1426_v15, 0.0 }
 0x6f1   :  { %1484 = vadd.xlane.f32.xlu0 %v1483_v45 }
 0x6f2   :  { %2729 = vmatmul.mubr.msk.f32.vlgmr.msra.gmra.mxu0 %vm423_vm5, %v3486_v0 }
 0x6f3   :  { %v1109_v44 = vpop.permute.xlu1 %1108  ;;  %1487 = vadd.xlane.f32.xlu1 %v1486_v11  ;;  %2806 = vmatprep.mubr.msk.f32.mxu0 %vm2878_vm1, %v2877_v3  ;;  %v1780_v23 = vpop.permute.xlu0 %1779 }
 0x6f4   :  { %v1138_v60 = vsel %vm423_vm5, %v1109_v44, 0.0  ;;  %v1806_v14 = vsel %vm423_vm5, %v1780_v23, 0.0 }
 0x6f5   :  { %1139 = vadd.xlane.f32.xlu0 %v1138_v60 }
 0x6f7   :  { %v1464_v61 = vpop.permute.xlu1 %1463  ;;  %1448 = vadd.xlane.f32.xlu1 %v1447_v59  ;;  %v1824_v7 = vpop.permute.xlu0 %1823 }
 0x6f8   :  { %v1489_v21 = vsel %vm423_vm5, %v1464_v61, 0.0  ;;  %v1848_v20 = vsel %vm423_vm5, %v1824_v7, 0.0 }
 0x6f9   :  { %1490 = vadd.xlane.f32.xlu0 %v1489_v21 }
 0x6fb   :  { %v1422_v40 = vpop.permute.xlu1 %1421  ;;  %1142 = vadd.xlane.f32.xlu1 %v1141_v27  ;;  %v1782_v55 = vpop.permute.xlu0 %1781 }
 0x6fc   :  { %v1450_v0 = vsel %vm423_vm5, %v1422_v40, 0.0  ;;  %v1809_v25 = vsel %vm423_vm5, %v1782_v55, 0.0 }
 0x6fd   :  { %1451 = vadd.xlane.f32.xlu0 %v1450_v0 }
 0x6ff   :  { %v1774_v2 = vpop.permute.xlu1 %1773  ;;  %1493 = vadd.xlane.f32.xlu1 %v1492_v1  ;;  %v1474_v63 = vpop.permute.xlu0 %1473 }
 0x700   :  { %v1797_v5 = vsel %vm423_vm5, %v1774_v2, 0.0  ;;  %v1504_v30 = vsel %vm423_vm5, %v1474_v63, 0.0 }
 0x701   :  { %1798 = vadd.xlane.f32.xlu0 %v1797_v5 }
 0x703   :  { %v1424_v9 = vpop.permute.xlu1 %1423  ;;  %1801 = vadd.xlane.f32.xlu1 %v1800_v6  ;;  %v1828_v29 = vpop.permute.xlu0 %1827 }
 0x704   :  { %v1453_v54 = vsel %vm423_vm5, %v1424_v9, 0.0  ;;  %v1854_v33 = vsel %vm423_vm5, %v1828_v29, 0.0 }
 0x705   :  { %1454 = vadd.xlane.f32.xlu0 %v1453_v54 }
 0x707   :  { %v1778_v13 = vpop.permute.xlu1 %1777  ;;  %1496 = vadd.xlane.f32.xlu1 %v1495_v19  ;;  %v1830_v34 = vpop.permute.xlu0 %1829 }
 0x708   :  { %v1803_v48 = vsel %vm423_vm5, %v1778_v13, 0.0  ;;  %v1857_v42 = vsel %vm423_vm5, %v1830_v34, 0.0 }
 0x709   :  { %1804 = vadd.xlane.f32.xlu0 %v1803_v48 }
 0x70b   :  { %v1470_v12 = vpop.permute.xlu1 %1469  ;;  %1457 = vadd.xlane.f32.xlu1 %v1456_v10  ;;  %v1832_v39 = vpop.permute.xlu0 %1831 }
 0x70c   :  { %v1498_v17 = vsel %vm423_vm5, %v1470_v12, 0.0  ;;  %v1860_v47 = vsel %vm423_vm5, %v1832_v39, 0.0 }
 0x70d   :  { %1499 = vadd.xlane.f32.xlu0 %v1498_v17 }
 0x70f   :  { %v1822_v18 = vpop.permute.xlu1 %1821  ;;  %1807 = vadd.xlane.f32.xlu1 %v1806_v14  ;;  %v1836_v31 = vpop.permute.xlu0 %1835 }
 0x710   :  { %v1845_v4 = vsel %vm423_vm5, %v1822_v18, 0.0  ;;  %v1866_v51 = vsel %vm423_vm5, %v1836_v31, 0.0 }
 0x711   :  { %1846 = vadd.xlane.f32.xlu0 %v1845_v4 }
 0x713   :  { %v1472_v16 = vpop.permute.xlu1 %1471  ;;  %1849 = vadd.xlane.f32.xlu1 %v1848_v20  ;;  %v1077_v52 = vpop.xlane.xlu0 %1076 }
 0x714   :  { %v1501_v24 = vsel %vm423_vm5, %v1472_v16, 0.0  ;;  %v1163_v58 = vrot.slane %v1077_v52, %v3378_v50 }
 0x715   :  { %1502 = vadd.xlane.f32.xlu0 %v1501_v24 }
 0x717   :  { %v1826_v28 = vpop.permute.xlu1 %1825  ;;  %1810 = vadd.xlane.f32.xlu1 %v1809_v25  ;;  %v1080_v56 = vpop.xlane.xlu0 %1079 }
 0x718   :  { %v1851_v41 = vsel %vm423_vm5, %v1826_v28, 0.0  ;;  %v1167_v8 = vrot.slane %v1080_v56, %v3378_v50 }
 0x719   :  { %1852 = vadd.xlane.f32.xlu0 %v1851_v41 }
 0x71b   :  { %v1784_v22 = vpop.permute.xlu1 %1783  ;;  %1505 = vadd.xlane.f32.xlu1 %v1504_v30  ;;  %v1122_v15 = vpop.xlane.xlu0 %1121 }
 0x71c   :  { %v1812_v36 = vsel %vm423_vm5, %v1784_v22, 0.0  ;;  %v1281_v23 = vrot.slane %v1122_v15, %v3378_v50 }
 0x71d   :  { %1813 = vadd.xlane.f32.xlu0 %v1812_v36 }
 0x71f   :  { %v1786_v37 = vpop.permute.xlu1 %1785  ;;  %1855 = vadd.xlane.f32.xlu1 %v1854_v33 }
 0x720   :  { %v1815_v38 = vsel %vm423_vm5, %v1786_v37, 0.0 }
 0x721   :  { %1816 = vadd.xlane.f32.xlu0 %v1815_v38 }
 0x723   :  { %v1788_v43 = vpop.permute.xlu1 %1787  ;;  %1858 = vadd.xlane.f32.xlu1 %v1857_v42 }
 0x724   :  { %v1818_v46 = vsel %vm423_vm5, %v1788_v43, 0.0 }
 0x725   :  { %1819 = vadd.xlane.f32.xlu0 %v1818_v46 }
 0x727   :  { %v1834_v26 = vpop.permute.xlu1 %1833  ;;  %1861 = vadd.xlane.f32.xlu1 %v1860_v47 }
 0x728   :  { %v1863_v49 = vsel %vm423_vm5, %v1834_v26, 0.0 }
 0x729   :  { %1864 = vadd.xlane.f32.xlu0 %v1863_v49 }
 0x72b   :  { %1867 = vadd.xlane.f32.xlu1 %v1866_v51 }
 0x758   :  { %v1074_v57 = vpop.xlane.xlu1 %1073 }
 0x759   :  { %v1159_v45 = vrot.slane %v1074_v57, %v3378_v50 }
 0x75b   :  { %v1188_v11 = vsel %vm813_vm6, %v1163_v58, %v1159_v45 }
 0x75c   :  { %v1083_v44 = vpop.xlane.xlu1 %1082  ;;  %v1189_v60 = vsel %vm815_vm7, %v1167_v8, %v1188_v11 }
 0x75d   :  { %v1171_v59 = vrot.slane %v1083_v44, %v3378_v50 }
 0x75f   :  { %v1190_v61 = vsel %vm817_vm8, %v1171_v59, %v1189_v60 }
 0x760   :  { %v1125_v21 = vpop.xlane.xlu1 %1124 }
 0x761   :  { %v1285_v27 = vrot.slane %v1125_v21, %v3378_v50 }
 0x762   :  { %v1086_v40 = vpop.xlane.xlu0 %1085 }
 0x763   :  { %v1175_v0 = vrot.slane %v1086_v40, %v3378_v50  ;;  %v1310_v6 = vsel %vm813_vm6, %v1285_v27, %v1281_v23 }
 0x764   :  { %v1128_v1 = vpop.xlane.xlu1 %1127 }
 0x765   :  { %v1191_v2 = vsel %vm819_vm9, %v1175_v0, %v1190_v61  ;;  %v1289_v5 = vrot.slane %v1128_v1, %v3378_v50 }
 0x766   :  { %v1089_v7 = vpop.xlane.xlu0 %1088 }
 0x767   :  { %v1311_v9 = vsel %vm815_vm7, %v1289_v5, %v1310_v6  ;;  %v1179_v42 = vrot.slane %v1089_v7, %v3378_v50 }
 0x768   :  { %v1131_v54 = vpop.xlane.xlu1 %1130 }
 0x769   :  { %v1293_v43 = vrot.slane %v1131_v54, %v3378_v50  ;;  %v1192_v56 = vsel %vm821_vm10, %v1179_v42, %v1191_v2 }
 0x76a   :  { %v1437_v19 = vpop.xlane.xlu0 %1436 }
 0x76b   :  { %v1522_v51 = vrot.slane %v1437_v19, %v3378_v50  ;;  %v1312_v57 = vsel %vm817_vm8, %v1293_v43, %v1311_v9 }
 0x76c   :  { %v1440_v13 = vpop.xlane.xlu1 %1439 }
 0x76d   :  { %v1526_v46 = vrot.slane %v1440_v13, %v3378_v50 }
 0x76e   :  { %v1092_v48 = vpop.xlane.xlu0 %1091 }
 0x76f   :  { %v1183_v47 = vrot.slane %v1092_v48, %v3378_v50  ;;  %v1551_v8 = vsel %vm813_vm6, %v1526_v46, %v1522_v51 }
 0x770   :  { %v1134_v55 = vpop.xlane.xlu1 %1133 }
 0x771   :  { %v1297_v26 = vrot.slane %v1134_v55, %v3378_v50  ;;  %v1193_v59 = vsel %vm823_vm11, %v1183_v47, %v1192_v56 }
 0x772   :  { %v1443_v10 = vpop.xlane.xlu0 %1442 }
 0x773   :  { %v1530_v49 = vrot.slane %v1443_v10, %v3378_v50  ;;  %v1313_v15 = vsel %vm819_vm9, %v1297_v26, %v1312_v57 }
 0x774   :  { %v3622_v12 = vpop.xlane.xlu1 %1094 }
 0x775   :  { %v1552_v61 = vsel %vm815_vm7, %v1530_v49, %v1551_v8  ;;  %v1187_v21 = vrot.slane %v3622_v12, %v3378_v50 }
 0x776   :  { %v1137_v17 = vpop.xlane.xlu0 %1136 }
 0x777   :  { %v1301_v58 = vrot.slane %v1137_v17, %v3378_v50 }
 0x778   :  { %v1446_v14 = vpop.xlane.xlu1 %1445 }
 0x779   :  { %v1534_v45 = vrot.slane %v1446_v14, %v3378_v50  ;;  %v1314_v5 = vsel %vm821_vm10, %v1301_v58, %v1313_v15 }
 0x77a   :  { %v1485_v63 = vpop.xlane.xlu0 %1484 }
 0x77b   :  { %v1644_v40 = vrot.slane %v1485_v63, %v3378_v50  ;;  %v1553_v6 = vsel %vm817_vm8, %v1534_v45, %v1552_v61 }
 0x77c   :  { %v1488_v18 = vpop.xlane.xlu1 %1487 }
 0x77d   :  { %v1648_v11 = vrot.slane %v1488_v18, %v3378_v50 }
 0x77e   :  { %v1140_v4 = vpop.xlane.xlu0 %1139 }
 0x77f   :  { %v1305_v44 = vrot.slane %v1140_v4, %v3378_v50  ;;  %v1673_v54 = vsel %vm813_vm6, %v1648_v11, %v1644_v40 }
 0x780   :  { %v1449_v20 = vpop.xlane.xlu1 %1448 }
 0x781   :  { %v1538_v27 = vrot.slane %v1449_v20, %v3378_v50  ;;  %v1315_v19 = vsel %vm823_vm11, %v1305_v44, %v1314_v5 }
 0x782   :  { %v1491_v16 = vpop.xlane.xlu0 %1490 }
 0x783   :  { %v1652_v0 = vrot.slane %v1491_v16, %v3378_v50  ;;  %v1554_v12 = vsel %vm819_vm9, %v1538_v27, %v1553_v6 }
 0x784   :  { %v1143_v24 = vpop.xlane.xlu1 %1142 }
 0x785   :  { %v1309_v23 = vrot.slane %v1143_v24, %v3378_v50  ;;  %v1674_v18 = vsel %vm815_vm7, %v1652_v0, %v1673_v54  ;;  %v1194_v24 = vsel %vm825_vm12, %v1187_v21, %v1193_v59 }
 0x786   :  { %v1452_v29 = vpop.xlane.xlu0 %1451 }
 0x787   :  { %v1542_v1 = vrot.slane %v1452_v29, %v3378_v50  ;;  %v1316_v29 = vsel %vm825_vm12, %v1309_v23, %v1315_v19 }
 0x788   :  { %v1494_v25 = vpop.xlane.xlu1 %1493 }
 0x789   :  { %v1656_v7 = vrot.slane %v1494_v25, %v3378_v50  ;;  %v1555_v4 = vsel %vm821_vm10, %v1542_v1, %v1554_v12 }
 0x78a   :  { %v1799_v28 = vpop.xlane.xlu0 %1798 }
 0x78b   :  { %v1884_v17 = vrot.slane %v1799_v28, %v3378_v50  ;;  %v1675_v25 = vsel %vm817_vm8, %v1656_v7, %v1674_v18 }
 0x78c   :  { %v1802_v41 = vpop.xlane.xlu1 %1801 }
 0x78d   :  { %v1888_v9 = vrot.slane %v1802_v41, %v3378_v50 }
 0x78e   :  { %v3624_v30 = vpop.xlane.xlu0 %1454 }
 0x78f   :  { %v1546_v13 = vrot.slane %v3624_v30, %v3378_v50  ;;  %v1913_v28 = vsel %vm813_vm6, %v1888_v9, %v1884_v17 }
 0x790   :  { %v1497_v34 = vpop.xlane.xlu1 %1496 }
 0x791   :  { %v1660_v48 = vrot.slane %v1497_v34, %v3378_v50  ;;  %v1556_v46 = vsel %vm823_vm11, %v1546_v13, %v1555_v4 }
 0x792   :  { %v3626_v22 = vpop.xlane.xlu0 %1804 }
 0x793   :  { %v1892_v14 = vrot.slane %v3626_v22, %v3378_v50  ;;  %v1676_v34 = vsel %vm819_vm9, %v1660_v48, %v1675_v25 }
 0x794   :  { %v3628_v36 = vpop.xlane.xlu1 %1457 }
 0x795   :  { %v1550_v63 = vrot.slane %v3628_v36, %v3378_v50  ;;  %v1914_v47 = vsel %vm815_vm7, %v1892_v14, %v1913_v28 }
 0x796   :  { %v3630_v33 = vpop.xlane.xlu0 %1499 }
 0x797   :  { %v1664_v41 = vrot.slane %v3630_v33, %v3378_v50 }
 0x798   :  { %v3632_v37 = vpop.xlane.xlu1 %1807 }
 0x799   :  { %v1896_v30 = vrot.slane %v3632_v37, %v3378_v50  ;;  %v1557_v37 = vsel %vm825_vm12, %v1550_v63, %v1556_v46  ;;  %v1677_v58 = vsel %vm821_vm10, %v1664_v41, %v1676_v34 }
 0x79a   :  { %v3634_v38 = vpop.xlane.xlu0 %1846 }
 0x79b   :  { %v2006_v49 = vrot.slane %v3634_v38, %v3378_v50  ;;  %v1915_v45 = vsel %vm817_vm8, %v1896_v30, %v1914_v47 }
 0x79c   :  { %v3636_v39 = vpop.xlane.xlu1 %1849 }
 0x79d   :  { %v2010_v22 = vrot.slane %v3636_v39, %v3378_v50 }
 0x79e   :  { %v3642_v31 = vpop.xlane.xlu0 %1502 }
 0x79f   :  { %v1668_v36 = vrot.slane %v3642_v31, %v3378_v50  ;;  %v2035_v11 = vsel %vm813_vm6, %v2010_v22, %v2006_v49 }
 0x7a0   :  { %v3647_v52 = vpop.xlane.xlu1 %1810 }
 0x7a1   :  { %v1900_v33 = vrot.slane %v3647_v52, %v3378_v50  ;;  %v1678_v38 = vsel %vm823_vm11, %v1668_v36, %v1677_v58 }
 0x7a2   :  { %v3656_v60 = vpop.xlane.xlu0 %1852 }
 0x7a3   :  { %v2014_v39 = vrot.slane %v3656_v60, %v3378_v50  ;;  %v1916_v61 = vsel %vm819_vm9, %v1900_v33, %v1915_v45 }
 0x7a4   :  { %v1506_v2 = vpop.xlane.xlu1 %1505 }
 0x7a5   :  { %v1672_v31 = vrot.slane %v1506_v2, %v3378_v50  ;;  %v2036_v0 = vsel %vm815_vm7, %v2014_v39, %v2035_v11 }
 0x7a6   :  { %v1814_v55 = vpop.xlane.xlu0 %1813  ;;  %v3677_v10 = vpop.f32.mrf.mxu0 }
 0x7a7   :  { %v1904_v51 = vrot.slane %v1814_v55, %v3378_v50  ;;  %v1679_v1 = vsel %vm825_vm12, %v1672_v31, %v1678_v38 }
 0x7a8   :  { %v1856_v20 = vpop.xlane.xlu1 %1855  ;;  %v2705_v16 = vpop.f32.mrf.mxu0 }
 0x7a9   :  { %v2018_v52 = vrot.slane %v1856_v20, %v3378_v50  ;;  %v1917_v23 = vsel %vm821_vm10, %v1904_v51, %v1916_v61 }
 0x7aa   :  { %v1817_v42 = vpop.xlane.xlu0 %1816  ;;  %v1266_v43 = vpop.f32.mrf.mxu0 }
 0x7ab   :  { %v1267_v26 = vadd.f32 %v1266_v43, %v1194_v24  ;;  %v1908_v44 = vrot.slane %v1817_v42, %v3378_v50  ;;  %v2037_v6 = vsel %vm817_vm8, %v2018_v52, %v2036_v0 }
 0x7ac   :  { %v1859_v56 = vpop.xlane.xlu1 %1858  ;;  %v2710_v57 = vpop.f32.mrf.mxu0 }
 0x7ad   :  { %v1318_v8 = vadd.f32 %v1316_v29, %v1267_v26  ;;  %v2022_v60 = vrot.slane %v1859_v56, %v3378_v50  ;;  %v1918_v48 = vsel %vm823_vm11, %v1908_v44, %v1917_v23 }
 0x7ae   :  { %v1820_v59 = vpop.xlane.xlu0 %1819  ;;  %v1629_v15 = vpop.f32.mrf.mxu0 }
 0x7af   :  { %v1319_v21 = vmul.f32 0.14433756, %v1318_v8  ;;  %v1912_v27 = vrot.slane %v1820_v59, %v3378_v50  ;;  %v1630_v40 = vadd.f32 %v1629_v15, %v1557_v37  ;;  %v2038_v19 = vsel %vm819_vm9, %v2022_v60, %v2037_v6  ;;  %v2156_v6 = vld [vmem:[%s3946_s14 + $0x20] sm:$0xff] }
 0x7b0   :  { %v1862_v2 = vpop.xlane.xlu1 %1861  ;;  %v2720_v5 = vpop.f32.mrf.mxu0 }
 0x7b1   :  { %v1681_v7 = vadd.f32 %v1679_v1, %v1630_v40  ;;  %v2026_v9 = vrot.slane %v1862_v2, %v3378_v50  ;;  %v1320_v54 = vadd.f32 %v1319_v21, %v3418_v53  ;;  %v1919_v63 = vsel %vm825_vm12, %v1912_v27, %v1918_v48  ;;  %v2159_v1 = vld [vmem:[%s3946_s14 + $0x38] sm:$0xff]  ;;  %v2158_v2 = vld [vmem:[%s3946_s14 + $0x30] sm:$0xff]  ;;  %v2157_v5 = vld [vmem:[%s3946_s14 + $0x28] sm:$0xff] }
 0x7b2   :  { %v1865_v13 = vpop.xlane.xlu0 %1864  ;;  %v1991_v55 = vpop.f32.mrf.mxu0 }
 0x7b3   :  { %v1682_v12 = vmul.f32 0.14433756, %v1681_v7  ;;  %v2039_v17 = vsel %vm821_vm10, %v2026_v9, %v2038_v19  ;;  %v2030_v14 = vrot.slane %v1865_v13, %v3378_v50  ;;  %v1321_v4 = vsel %vm953_vm13, %v1320_v54, -inf  ;;  %v2155_v7 = vld [vmem:[%s3946_s14 + $0x18] sm:$0xff]  ;;  %v2153_v13 = vld [vmem:[%s3946_s14 + $0x8] sm:$0xff] }
 0x7b4   :  { %v1868_v18 = vpop.xlane.xlu1 %1867  ;;  %v2730_v20 = vpop.f32.mrf.mxu0  ;;  %1322 = vmax.xlane.f32.xlu0 %v1321_v4  ;;  %v1992_v25 = vadd.f32 %v1991_v55, %v1919_v63 }
 0x7b5   :  { %v2040_v16 = vsel %vm823_vm11, %v2030_v14, %v2039_v17  ;;  %v2034_v24 = vrot.slane %v1868_v18, %v3378_v50  ;;  %v1683_v29 = vadd.f32 %v1682_v12, %v3418_v53  ;;  %v2152_v12 = vld [vmem:[%s3946_s14] sm:$0xff] }
 0x7b7   :  { %v2041_v28 = vsel %vm825_vm12, %v2034_v24, %v2040_v16  ;;  %v1684_v41 = vsel %vm953_vm13, %v1683_v29, -inf }
 0x7b8   :  { %v2043_v30 = vadd.f32 %v2041_v28, %v1992_v25  ;;  %1685 = vmax.xlane.f32.xlu1 %v1684_v41 }
 0x7ba   :  { %v2044_v34 = vmul.f32 0.14433756, %v2043_v30 }
 0x7bc   :  { %v2045_v22 = vadd.f32 %v2044_v34, %v3418_v53 }
 0x7be   :  { %v2046_v36 = vsel %vm953_vm13, %v2045_v22, -inf }
 0x7bf   :  { %2047 = vmax.xlane.f32.xlu0 %v2046_v36 }
 0x83d   :  { %v1323_v42 = vpop.xlane.xlu0 %1322 }
 0x83e   :  { %v1324_v43 = vsub.f32 %v1320_v54, %v1323_v42  ;;  %v2154_v54 = vld [vmem:[%s3946_s14 + $0x10] sm:$0xff] }
 0x840   :  { %v1325_v46 = vmul.f32 1.442695, %v1324_v43 }
 0x841   :  { %v1686_v50 = vpop.xlane.xlu1 %1685 }
 0x842   :  { %v1687_v47 = vsub.f32 %v1683_v29, %v1686_v50  ;;  %2834 = vpow2.f32 %v1325_v46  ;;  %v2558_v29 = vld [vmem:[%s3947_s15] ss:$0 sm:$0xff]  ;;  %v2277_v46 = vld [vmem:[%s3950_s18 + $0x38] sm:$0xff]  ;;  %v2275_v50 = vld [vmem:[%s3950_s18 + $0x28] sm:$0xff]  ;;  %s3979_s15 = sld [smem:[#allocation14_spill]] }
 0x844   :  { %v1688_v33 = vmul.f32 1.442695, %v1687_v47  ;;  %v2274_v47 = vld [vmem:[%s3950_s18 + $0x20] sm:$0xff] }
 0x846   :  { %2836 = vpow2.f32 %v1688_v33  ;;  %v2273_v33 = vld [vmem:[%s3950_s18 + $0x18] sm:$0xff] }
 0x848   :  { %v2048_v51 = vpop.xlane.xlu0 %2047 }
 0x849   :  { %v2049_v56 = vsub.f32 %v2045_v22, %v2048_v51 }
 0x84b   :  { %v2050_v57 = vmul.f32 1.442695, %v2049_v56  ;;  %v2560_v56 = vld [vmem:[%s3948_s16] ss:$0 sm:$0xff] }
 0x84d   :  { %2838 = vpow2.f32 %v2050_v57 }
 0x84f   :  { %v2835_v26 = vpop.eup %2834 }
 0x850   :  { %v1327_v37 = vmul.f32 %v2835_v26, %v3404_v35  ;;  %v2272_v26 = vld [vmem:[%s3950_s18 + $0x10] sm:$0xff] }
 0x852   :  { %v1328_v39 = vsel %vm953_vm13, %v1327_v37, 0.0 }
 0x853   :  { %v2837_v49 = vpop.eup %2836  ;;  %1329 = vadd.xlane.f32.xlu1 %v1328_v39 }
 0x854   :  { %v1690_v53 = vmul.f32 %v2837_v49, %v3404_v35  ;;  %v2270_v49 = vld [vmem:[%s3950_s18] sm:$0xff] }
 0x856   :  { %v1691_v31 = vsel %vm953_vm13, %v1690_v53, 0.0 }
 0x857   :  { %1692 = vadd.xlane.f32.xlu0 %v1691_v31 }
 0x85a   :  { %v2839_v58 = vpop.eup %2838 }
 0x85b   :  { %v2052_v45 = vmul.f32 %v2839_v58, %v3404_v35  ;;  %v2561_v58 = vld [vmem:[%s3949_s17] ss:$0 sm:$0xff] }
 0x85d   :  { %v2053_v52 = vsel %vm953_vm13, %v2052_v45, 0.0 }
 0x864   :  { %1697 = vrot.lane.b32.xlu1 %v3254_v62, %s2886_s25 }
 0x86d   :  { %1335 = vrot.lane.b32.xlu0 %v3254_v62, %s2882_s30 }
 0x888   :  { %2054 = vadd.xlane.f32.xlu1 %v2053_v52 }
 0x899   :  { %2059 = vrot.lane.b32.xlu1 %v3254_v62, %s2887_s13 }
 0x8dc   :  { %v1330_v8 = vpop.xlane.xlu1 %1329 }
 0x8dd   :  { %v1331_v11 = vmax.f32 %v1330_v8, 1e-30  ;;  %v2400_v8 = vld [vmem:[%s3952_s20 + $0x78] sm:$0xff] }
 0x8de   :  { %2775 = vmatpush3.msra.mxu0 %v2400_v8 }
 0x8df   :  { %2840 = vrcp.f32 %v1331_v11  ;;  %2776 = vmatprep.subr.mxu0 %v2877_v3  ;;  %v2399_v11 = vld [vmem:[%s3952_s20 + $0x70] sm:$0xff] }
 0x8e0   :  { %v1693_v38 = vpop.xlane.xlu0 %1692  ;;  %v1698_v35 = vpop.permute.xlu1 %1697  ;;  %2777 = vmatpush3.msra.mxu0 %v2399_v11 }
 0x8e1   :  { %v1694_v44 = vmax.f32 %v1693_v38, 1e-30  ;;  %2778 = vmatprep.subr.mxu0 %v2877_v3  ;;  %v2398_v38 = vld [vmem:[%s3952_s20 + $0x68] sm:$0xff] }
 0x8e2   :  { %2779 = vmatpush3.msra.mxu0 %v2398_v38 }
 0x8e3   :  { %2842 = vrcp.f32 %v1694_v44  ;;  %2780 = vmatprep.subr.mxu0 %v2877_v3  ;;  %v2397_v44 = vld [vmem:[%s3952_s20 + $0x60] sm:$0xff] }
 0x8e4   :  { %v1336_v60 = vpop.permute.xlu0 %1335  ;;  %2781 = vmatpush3.msra.mxu0 %v2397_v44 }
 0x8e5   :  { %2712 = vmatpush3.msra.mxu1 %v1336_v60  ;;  %2782 = vmatprep.subr.mxu0 %v2877_v3  ;;  %v2396_v60 = vld [vmem:[%s3952_s20 + $0x58] sm:$0xff] }
 0x8e6   :  { %2721 = vmatprep.subr.mxu1 %v2877_v3  ;;  %2783 = vmatpush3.msra.mxu0 %v2396_v60 }
 0x8e7   :  { %2784 = vmatprep.subr.mxu0 %v2877_v3 }
 0x8ec   :  { %v2841_v59 = vpop.eup %2840 }
 0x8ed   :  { %v1333_v15 = vmul.f32 %v2841_v59, %v1327_v37  ;;  %v2271_v37 = vld [vmem:[%s3950_s18 + $0x8] sm:$0xff]  ;;  %v2395_v59 = vld [vmem:[%s3952_s20 + $0x50] sm:$0xff] }
 0x8ee   :  { %2785 = vmatpush3.msra.mxu0 %v2395_v59 }
 0x8ef   :  { %2714 = vmatmul.mubr.msk.f32.vlgmr.msra.gmra.mxu1 %vm953_vm13, %v1333_v15  ;;  %2786 = vmatprep.subr.mxu0 %v2877_v3  ;;  %v2394_v15 = vld [vmem:[%s3952_s20 + $0x48] sm:$0xff] }
 0x8f0   :  { %v2843_v61 = vpop.eup %2842  ;;  %2722 = vmatpush3.msra.mxu1 %v1698_v35  ;;  %2723 = vmatprep.mubr.msk.f32.mxu1 %vm2878_vm1, %v2877_v3  ;;  %v2392_v35 = vld [vmem:[%s3952_s20 + $0x38] sm:$0xff] }
 0x8f1   :  { %v1696_v62 = vmul.f32 %v2843_v61, %v1690_v53  ;;  %2731 = vmatprep.subr.mxu1 %v2877_v3  ;;  %2787 = vmatpush3.msra.mxu0 %v2394_v15  ;;  %v2393_v61 = vld [vmem:[%s3952_s20 + $0x40] sm:$0xff] }
 0x8f2   :  { %2788 = vmatprep.subr.mxu0 %v2877_v3 }
 0x8f3   :  { %2724 = vmatmul.mubr.msk.f32.vlgmr.msra.gmra.mxu1 %vm953_vm13, %v1696_v62  ;;  %2789 = vmatpush3.msra.mxu0 %v2393_v61  ;;  %v2391_v62 = vld [vmem:[%s3952_s20 + $0x30] sm:$0xff] }
 0x8f4   :  { %2733 = vmatprep.mubr.msk.f32.mxu1 %vm2878_vm1, %v2877_v3  ;;  %2790 = vmatprep.subr.mxu0 %v2877_v3 }
 0x8f5   :  { %2791 = vmatpush3.msra.mxu0 %v2392_v35 }
 0x8f6   :  { %2792 = vmatprep.subr.mxu0 %v2877_v3 }
 0x8f7   :  { %2793 = vmatpush3.msra.mxu0 %v2391_v62 }
 0x8f8   :  { %2794 = vmatprep.subr.mxu0 %v2877_v3 }
 0x911   :  { %v2055_v21 = vpop.xlane.xlu1 %2054 }
 0x912   :  { %v2056_v27 = vmax.f32 %v2055_v21, 1e-30  ;;  %v2390_v21 = vld [vmem:[%s3952_s20 + $0x28] sm:$0xff] }
 0x913   :  { %2795 = vmatpush3.msra.mxu0 %v2390_v21 }
 0x914   :  { %2844 = vrcp.f32 %v2056_v27  ;;  %2796 = vmatprep.subr.mxu0 %v2877_v3  ;;  %v2389_v27 = vld [vmem:[%s3952_s20 + $0x20] sm:$0xff] }
 0x915   :  { %v2060_v40 = vpop.permute.xlu1 %2059  ;;  %2797 = vmatpush3.msra.mxu0 %v2389_v27 }
 0x916   :  { %2732 = vmatpush3.msra.mxu1 %v2060_v40  ;;  %2798 = vmatprep.subr.mxu0 %v2877_v3  ;;  %v2388_v40 = vld [vmem:[%s3952_s20 + $0x18] sm:$0xff] }
 0x917   :  { %2736 = vmatprep.subr.mxu1 %v2877_v3  ;;  %2799 = vmatpush3.msra.mxu0 %v2388_v40 }
 0x918   :  { %2800 = vmatprep.subr.mxu0 %v2877_v3 }
 0x921   :  { %v2845_v0 = vpop.eup %2844 }
 0x922   :  { %v2058_v23 = vmul.f32 %v2845_v0, %v2052_v45  ;;  %v2387_v0 = vld [vmem:[%s3952_s20 + $0x10] sm:$0xff] }
 0x923   :  { %2801 = vmatpush3.msra.mxu0 %v2387_v0 }
 0x924   :  { %2734 = vmatmul.mubr.msk.f32.vlgmr.msra.gmra.mxu1 %vm953_vm13, %v2058_v23  ;;  %2802 = vmatprep.subr.mxu0 %v2877_v3  ;;  %v2386_v23 = vld [vmem:[%s3952_s20 + $0x8] sm:$0xff] }
 0x925   :  { %2752 = vmatprep.mubr.msk.f32.mxu1 %vm2878_vm1, %v2877_v3  ;;  %2737 = vmatpush3.msra.mxu1 %v2159_v1  ;;  %v2385_v1 = vld [vmem:[%s3952_s20] sm:$0xff] }
 0x926   :  { %2738 = vmatprep.subr.mxu1 %v2877_v3  ;;  %2803 = vmatpush3.msra.mxu0 %v2386_v23 }
 0x927   :  { %2739 = vmatpush3.msra.mxu1 %v2158_v2  ;;  %2804 = vmatprep.subr.mxu0 %v2877_v3  ;;  %v2562_v2 = vld [vmem:[%s3979_s15] ss:$0 sm:$0xff] }
 0x928   :  { %2740 = vmatprep.subr.mxu1 %v2877_v3  ;;  %2805 = vmatpush3.msra.mxu0 %v2385_v1 }
 0x929   :  { %2741 = vmatpush3.msra.mxu1 %v2157_v5 }
 0x92a   :  { %2742 = vmatprep.subr.mxu1 %v2877_v3 }
 0x92b   :  { %2743 = vmatpush3.msra.mxu1 %v2156_v6 }
 0x92c   :  { %2744 = vmatprep.subr.mxu1 %v2877_v3 }
 0x92d   :  { %2745 = vmatpush3.msra.mxu1 %v2155_v7 }
 0x92e   :  { %2746 = vmatprep.subr.mxu1 %v2877_v3 }
 0x92f   :  { %2747 = vmatpush3.msra.mxu1 %v2154_v54 }
 0x930   :  { %2748 = vmatprep.subr.mxu1 %v2877_v3 }
 0x931   :  { %2749 = vmatpush3.msra.mxu1 %v2153_v13 }
 0x932   :  { %2750 = vmatprep.subr.mxu1 %v2877_v3 }
 0x933   :  { %2751 = vmatpush3.msra.mxu1 %v2152_v12 }
 0x934   :  { %2755 = vmatprep.subr.mxu1 %v2877_v3 }
 0x9af   :  { %v1407_v9 = vpop.f32.mrf.mxu1 }
 0x9b0   :  { %2136 = vrot.lane.b32.xlu0 %v1407_v9, %s2884_s19 }
 0x9b1   :  { %v2715_v19 = vpop.f32.mrf.mxu1 }
 0x9b3   :  { %v1769_v48 = vpop.f32.mrf.mxu1 }
 0x9b4   :  { %2140 = vrot.lane.b32.xlu1 %v1769_v48, %s2883_s10 }
 0x9b5   :  { %v2725_v55 = vpop.f32.mrf.mxu1 }
 0x9e4   :  { %v2131_v17 = vpop.f32.mrf.mxu1 }
 0x9e5   :  { %2144 = vrot.lane.b32.xlu0 %v2131_v17, %s2885_s3 }
 0x9e6   :  { %v2735_v14 = vpop.f32.mrf.mxu1 }
 0xa22   :  { %v2137_v63 = vpop.permute.xlu0 %2136 }
 0xa23   :  { %v2147_v4 = vsel %vm423_vm5, %v3677_v10, %v2137_v63 }
 0xa26   :  { %v2141_v18 = vpop.permute.xlu1 %2140 }
 0xa27   :  { %v2149_v20 = vsel %vm2148_vm14, %v2147_v4, %v2141_v18 }
 0xa57   :  { %v2145_v16 = vpop.permute.xlu0 %2144 }
 0xa58   :  { %v2151_v24 = vsel %vm2150_vm15, %v2149_v20, %v2145_v16 }
 0xa59   :  { %2753 = vmatmul.mubr.msk.f32.vlgmr.msra.gmra.mxu1 %vm221_vm2, %v2151_v24 }
 0xa5a   :  { %2771 = vmatprep.mubr.msk.f32.mxu1 %vm2878_vm1, %v2877_v3  ;;  %2756 = vmatpush3.msra.mxu1 %v2277_v46 }
 0xa5b   :  { %2757 = vmatprep.subr.mxu1 %v2877_v3 }
 0xb19   :  { %v2236_v25 = vpop.f32.mrf.mxu1 }
 0xb1a   :  { %v2237_v28 = vadd.f32 %v2558_v29, %v2236_v25 }
 0xb1b   :  { %v2754_v41 = vpop.f32.mrf.mxu1 }
 0xb1c   :  { %v2240_v30 = vadd.f32 %v2237_v28, %v3190_v32  ;;  %v2276_v32 = vld [vmem:[%s3950_s18 + $0x30] sm:$0xff] }
 0xb1d   :  { %2758 = vmatpush3.msra.mxu1 %v2276_v32 }
 0xb1e   :  { %v2243_v34 = vsel %vm221_vm2, %v2240_v30, 0.0  ;;  %2759 = vmatprep.subr.mxu1 %v2877_v3 }
 0xb1f   :  { %2244 = vadd.xlane.f32.xlu1 %v2243_v34  ;;  %2760 = vmatpush3.msra.mxu1 %v2275_v50 }
 0xb20   :  { %2761 = vmatprep.subr.mxu1 %v2877_v3 }
 0xb21   :  { %2762 = vmatpush3.msra.mxu1 %v2274_v47 }
 0xb22   :  { %2763 = vmatprep.subr.mxu1 %v2877_v3 }
 0xb23   :  { %2764 = vmatpush3.msra.mxu1 %v2273_v33 }
 0xb24   :  { %2765 = vmatprep.subr.mxu1 %v2877_v3 }
 0xb25   :  { %2766 = vmatpush3.msra.mxu1 %v2272_v26 }
 0xb26   :  { %2767 = vmatprep.subr.mxu1 %v2877_v3 }
 0xb27   :  { %2768 = vmatpush3.msra.mxu1 %v2271_v37 }
 0xb28   :  { %2769 = vmatprep.subr.mxu1 %v2877_v3 }
 0xb29   :  { %2770 = vmatpush3.msra.mxu1 %v2270_v49 }
 0xba8   :  { %v2245_v10 = vpop.xlane.xlu1 %2244 }
 0xba9   :  { %v2246_v22 = vmul.f32 0.015625, %v2245_v10 }
 0xbab   :  { %v2247_v36 = vsub.f32 %v2240_v30, %v2246_v22 }
 0xbad   :  { %v2248_v42 = vmul.f32 %v2247_v36, %v2247_v36 }
 0xbaf   :  { %v2249_v43 = vsel %vm221_vm2, %v2248_v42, 0.0  ;;  %v2564_v42 = vld [vmem:[%s3953_s21] ss:$0 sm:$0xff] }
 0xbb0   :  { %2250 = vadd.xlane.f32.xlu0 %v2249_v43 }
 0xc39   :  { %v2251_v39 = vpop.xlane.xlu0 %2250 }
 0xc3a   :  { %v2252_v53 = vmul.f32 0.015625, %v2251_v39 }
 0xc3c   :  { %v2253_v31 = vadd.f32 1e-07, %v2252_v53 }
 0xc3e   :  { %2846 = vrsqrt.f32 %v2253_v31 }
 0xc4b   :  { %v2847_v51 = vpop.eup %2846 }
 0xc4c   :  { %v2255_v57 = vmul.f32 %v2847_v51, %v2247_v36 }
 0xc4e   :  { %v2262_v45 = vmul.f32 %v2560_v56, %v2255_v57  ;;  %v2565_v57 = vld [vmem:[%s3954_s22] ss:$0 sm:$0xff] }
 0xc50   :  { %v3846_v52 = vadd.f32 %v2561_v58, %v2262_v45  ;;  %v2566_v45 = vld [vmem:[%s3955_s23] ss:$0 sm:$0xff] }
 0xc52   :  { %2772 = vmatmul.mubr.msk.f32.vlgmr.msra.gmra.mxu1 %vm221_vm2, %v3846_v52 }
 0xd12   :  { %v2354_v5 = vpop.f32.mrf.mxu1 }
 0xd13   :  { %v2355_v6 = vadd.f32 %v2562_v2, %v2354_v5 }
 0xd14   :  { %v2773_v7 = vpop.f32.mrf.mxu1 }
 0xd15   :  { %v2359_v9 = vmul.f32 0.70710677, %v2355_v6  ;;  %v2358_v10 = vmul.f32 0.5, %v2355_v6 }
 0xd17   :  { %v2360_v54 = vand.u32 2147483647, %v2359_v9  ;;  %vm2380_vm0 = vcmp.lt.f32.partialorder %v2359_v9, 0.0 }
 0xd19   :  { %v2361_v19 = vmul.f32 0.3275911, %v2360_v54  ;;  %v2374_v48 = vsub.f32 0.0, %v2360_v54 }
 0xd1b   :  { %v2362_v13 = vadd.f32 1.0, %v2361_v19  ;;  %v2375_v55 = vmul.f32 %v2374_v48, %v2360_v54 }
 0xd1d   :  { %2848 = vrcp.f32 %v2362_v13  ;;  %v2376_v14 = vmul.f32 1.442695, %v2375_v55 }
 0xd1f   :  { %2850 = vpow2.f32 %v2376_v14 }
 0xd2a   :  { %v2849_v12 = vpop.eup %2848 }
 0xd2b   :  { %v2365_v17 = vmul.f32 1.0614054, %v2849_v12 }
 0xd2c   :  { %v2851_v25 = vpop.eup %2850 }
 0xd2d   :  { %v2366_v63 = vadd.f32 -1.4531521, %v2365_v17 }
 0xd2f   :  { %v2367_v3 = vmul.f32 %v2849_v12, %v2366_v63 }
 0xd31   :  { %v2368_v18 = vadd.f32 1.4214138, %v2367_v3 }
 0xd33   :  { %v2369_v4 = vmul.f32 %v2849_v12, %v2368_v18 }
 0xd35   :  { %v2370_v20 = vadd.f32 -0.28449672, %v2369_v4 }
 0xd37   :  { %v2371_v16 = vmul.f32 %v2849_v12, %v2370_v20 }
 0xd39   :  { %v2372_v24 = vadd.f32 0.2548296, %v2371_v16 }
 0xd3b   :  { %v2373_v29 = vmul.f32 %v2849_v12, %v2372_v24 }
 0xd3d   :  { %v2378_v28 = vmul.f32 %v2851_v25, %v2373_v29 }
 0xd3f   :  { %v2379_v41 = vsub.f32 1.0, %v2378_v28 }
 0xd41   :  { %v2381_v30 = vsub.f32 0.0, %v2379_v41 }
 0xd43   :  { %v2382_v34 = vsel %vm2380_vm0, %v2381_v30, %v2379_v41 }
 0xd44   :  { %v2383_v22 = vadd.f32 1.0, %v2382_v34 }
 0xd46   :  { %v2384_v36 = vmul.f32 %v2383_v22, %v2358_v10 }
 0xd48   :  { %2807 = vmatmul.mubr.f32.vlgmr.msra.gmra.mxu0 %v2384_v36 }
 0xe08   :  { %v2474_v43 = vpop.f32.mrf.mxu0 }
 0xe09   :  { %v2475_v46 = vadd.f32 %v2564_v42, %v2474_v43 }
 0xe0a   :  { %v2808_v32 = vpop.f32.mrf.mxu0 }
 0xe0b   :  { %v2478_v50 = vadd.f32 %v2475_v46, %v3846_v52 }
 0xe0d   :  { %v2481_v47 = vsel %vm221_vm2, %v2478_v50, 0.0 }
 0xe0e   :  { %2482 = vadd.xlane.f32.xlu0 %v2481_v47 }
 0xe97   :  { %v2483_v33 = vpop.xlane.xlu0 %2482 }
 0xe98   :  { %v2484_v26 = vmul.f32 0.015625, %v2483_v33 }
 0xe9a   :  { %v2485_v37 = vsub.f32 %v2478_v50, %v2484_v26 }
 0xe9c   :  { %v2486_v49 = vmul.f32 %v2485_v37, %v2485_v37 }
 0xe9e   :  { %v2487_v39 = vsel %vm221_vm2, %v2486_v49, 0.0 }
 0xe9f   :  { %2488 = vadd.xlane.f32.xlu1 %v2487_v39 }
 0xf28   :  { %v2489_v53 = vpop.xlane.xlu1 %2488 }
 0xf29   :  { %v2490_v31 = vmul.f32 0.015625, %v2489_v53 }
 0xf2b   :  { %v2491_v51 = vadd.f32 1e-07, %v2490_v31 }
 0xf2d   :  { %2852 = vrsqrt.f32 %v2491_v51 }
 0xf3a   :  { %v2853_v56 = vpop.eup %2852 }
 0xf3b   :  { %v2493_v58 = vmul.f32 %v2853_v56, %v2485_v37 }
 0xf3d   :  { %v2500_v52 = vmul.f32 %v2565_v57, %v2493_v58 }
 0xf3f   :  { %v2507_v8 = vadd.f32 %v2566_v45, %v2500_v52 }
 0xf41   :  { %2508 = vst.msk [vmem:[#allocation2] sm:$0xff] %vm221_vm2, %v2507_v8 }
 0xf42   :  { %2865 = shalt.err (!%p2862_p4)
}
 0xf43   :  { %2518 = dma.vmem_to_hbm [thread:$0]  %s2516_s5, 128, %s3956_s24, [#allocation3]  }
 0xf44   :  { %2874 = dma.done.wait [#allocation3], 128  }
 0xf45   :  { %2875 = vsyncadd [#allocation3], 4294967168 }
 0xf46   :  { %2522 = vsyncpa [#allocation3], 1 }

</bundles_post_ra>
